<compile_context>
chip_gen: v7x
topology: tpu7x:2x2x1
jax: 0.10.0
libtpu: 0.0.40
codegen_flags: <defaults>
</compile_context>

<pallas_src>
import jax
import jax.numpy as jnp
import numpy as np
from jax import lax
from jax.experimental import pallas as pl
from jax.experimental.pallas import tpu as pltpu


def _dot_nt(a, b):
    # Contract last dims: a (m, k) x b (n, k) -> (m, n)   (== a @ b.T)
    return lax.dot_general(a, b, (((1,), (1,)), ((), ())),
                           preferred_element_type=jnp.float32)


def _dot_tn(a, b):
    # Contract first dims: a (k, m) x b (k, n) -> (m, n)  (== a.T @ b)
    return lax.dot_general(a, b, (((0,), (0,)), ((), ())),
                           preferred_element_type=jnp.float32)


def _softmax_last(a):
    m = jnp.max(a, axis=-1, keepdims=True)
    e = jnp.exp(a - m)
    s = jnp.sum(e, axis=-1, keepdims=True)
    # EUP reciprocal + broadcast multiply instead of an N^2 VPU divide.
    return e * pl.reciprocal(s, approx=True)


def _sca_kernel(x_ref, wall_ref, wc_ref, wo_ref, o_ref):
    xb = x_ref[0]                                   # (C, N), lane-dense
    qd = wall_ref.shape[0] // 7
    relu = lambda t: jnp.maximum(t, 0.0)

    # ---- fused 1x1 conv + ReLU projections: (7qd, C) @ (C, N) -> (7qd, N) ----
    proj = relu(jnp.dot(wall_ref[...], xb, preferred_element_type=jnp.float32))
    q1 = proj[0 * qd:1 * qd]
    k1 = proj[1 * qd:2 * qd]
    q2 = proj[2 * qd:3 * qd]
    k2 = proj[3 * qd:4 * qd]
    q3 = proj[4 * qd:5 * qd]
    k3 = proj[5 * qd:6 * qd]
    v = proj[6 * qd:7 * qd]                        # each (qd, N)

    # ---- self-attention branch: softmax(q1^T k1) applied to v ----------------
    attn = _softmax_last(_dot_tn(q1, k1))           # (N, N), rows = queries
    x_attn = _dot_nt(v, attn)                       # (qd, N), stays lane-dense

    # ---- spatial enhancement branch ------------------------------------------
    sp = _softmax_last(_dot_tn(q2, k2))             # (N, N)
    sp_sum = jnp.sum(sp, axis=0, keepdims=True)     # (1, N)  sum over queries
    sp_max = jnp.max(sp_sum, axis=-1, keepdims=True)
    sp_min = jnp.min(sp_sum, axis=-1, keepdims=True)
    sp_norm = (sp_sum - sp_min) * pl.reciprocal(sp_max - sp_min, approx=True)

    # ---- channel enhancement branch -------------------------------------------
    ch = _softmax_last(_dot_nt(q3, k3))             # (qd, qd)
    ch_sum = jnp.sum(ch, axis=0, keepdims=True)     # (1, qd)
    ch_max = jnp.max(ch_sum, axis=-1, keepdims=True)
    ch_min = jnp.min(ch_sum, axis=-1, keepdims=True)
    ch_norm = (ch_sum - ch_min) * pl.reciprocal(ch_max - ch_min, approx=True)
    ch_att = relu(_dot_nt(wc_ref[...], ch_norm))    # (C, 1)  channel_conv 1x1

    enhance = sp_norm + ch_att                      # (C, N) via broadcast

    # ---- output conv + residual + enhancement ---------------------------------
    y = relu(jnp.dot(wo_ref[...], x_attn, preferred_element_type=jnp.float32))
    o_ref[0] = (y + xb) * enhance                   # (C, N), unmasked store


def spacial_channel_enhanced_attention_pallas(x_nchw, params):
    B, C, H, W = x_nchw.shape
    N = H * W
    x_bcn = x_nchw.reshape(B, C, N)                 # no transpose needed

    w_all = jnp.concatenate(
        [params[n] for n in ["wq1", "wk1", "wq2", "wk2", "wq3", "wk3", "wv"]],
        axis=0)                                     # (7*qd, C)
    wc, wo = params["wc"], params["wo"]
    qd = params["wq1"].shape[0]
    out_dim = wo.shape[0]

    flops = B * (2 * 7 * qd * C * N                 # fused projections
                 + 3 * 2 * N * N * qd               # q1k1, attn@v, q2k2
                 + 2 * qd * qd * N                  # q3 k3^T
                 + 2 * out_dim * qd * N             # output conv
                 + 2 * C * qd)                      # channel conv
    transcendentals = B * (2 * N * N + qd * qd + 2 * N + 2 * qd + 4)
    bytes_accessed = 4 * (B * C * N + B * out_dim * N
                          + w_all.size + wc.size + wo.size)

    out = pl.pallas_call(
        _sca_kernel,
        out_shape=jax.ShapeDtypeStruct((B, out_dim, N), jnp.float32),
        grid_spec=pltpu.PrefetchScalarGridSpec(
            num_scalar_prefetch=0,
            grid=(B,),
            in_specs=[
                pl.BlockSpec((1, C, N), lambda b: (b, 0, 0)),
                pl.BlockSpec(w_all.shape, lambda b: (0, 0)),
                pl.BlockSpec(wc.shape, lambda b: (0, 0)),
                pl.BlockSpec(wo.shape, lambda b: (0, 0)),
            ],
            out_specs=pl.BlockSpec((1, out_dim, N), lambda b: (b, 0, 0)),
        ),
        compiler_params=pltpu.CompilerParams(
            dimension_semantics=("parallel",)),      # megacore sharding on v7x
        cost_estimate=pl.CostEstimate(
            flops=flops, transcendentals=transcendentals,
            bytes_accessed=bytes_accessed),
    )(x_bcn, w_all, wc, wo)

    return out.reshape(B, out_dim, H, W)


def _ref_forward(x, p):
    # Plain-JAX mirror of the PyTorch forward (validation only).
    B, C, H, W = x.shape
    N = H * W
    qd = p["wq1"].shape[0]
    relu = jax.nn.relu

    def proj(w):
        y = relu(jnp.einsum("oc,bchw->bohw", w, x))
        return y.reshape(B, qd, N).transpose(0, 2, 1)  # (B, N, qd)

    q1, k1, q2, k2, q3, k3, v = (proj(p[n]) for n in
                                 ["wq1", "wk1", "wq2", "wk2", "wq3", "wk3", "wv"])

    attn = jax.nn.softmax(q1 @ jnp.swapaxes(k1, -1, -2), axis=-1)
    xa = (attn @ v).transpose(0, 2, 1).reshape(B, qd, H, W)

    sp = jax.nn.softmax(q2 @ jnp.swapaxes(k2, -1, -2), axis=-1)
    sps = jnp.sum(sp, axis=1, keepdims=True)                      # (B,1,N)
    spn = (sps - sps.min(-1, keepdims=True)) / (
        sps.max(-1, keepdims=True) - sps.min(-1, keepdims=True))
    spn = jnp.broadcast_to(spn, (B, C, N)).reshape(B, C, H, W)

    ch = jax.nn.softmax(jnp.swapaxes(q3, -1, -2) @ k3, axis=-1)   # (B,qd,qd)
    chs = jnp.sum(ch, axis=1, keepdims=True)
    chn = (chs - chs.min(-1, keepdims=True)) / (
        chs.max(-1, keepdims=True) - chs.min(-1, keepdims=True))
    chn = chn[:, 0, :]                                            # (B, qd)
    ch_att = relu(jnp.einsum("oc,bc->bo", p["wc"], chn))[:, :, None, None]
    ch_att = jnp.broadcast_to(ch_att, (B, C, H, W))

    enhance = spn + ch_att
    y = relu(jnp.einsum("oc,bchw->bohw", p["wo"], xa))
    return (y + x) * enhance


def _init_params(key, dim, r=2, out_dim=None):
    qd = dim // r
    if out_dim is None:
        out_dim = dim
    keys = jax.random.split(key, 9)
    scale = 0.2
    return {
        "wq1": scale * jax.random.normal(keys[0], (qd, dim), jnp.float32),
        "wk1": scale * jax.random.normal(keys[1], (qd, dim), jnp.float32),
        "wq2": scale * jax.random.normal(keys[2], (qd, dim), jnp.float32),
        "wk2": scale * jax.random.normal(keys[3], (qd, dim), jnp.float32),
        "wq3": scale * jax.random.normal(keys[4], (qd, dim), jnp.float32),
        "wk3": scale * jax.random.normal(keys[5], (qd, dim), jnp.float32),
        "wv":  scale * jax.random.normal(keys[6], (qd, dim), jnp.float32),
        "wc":  scale * jax.random.normal(keys[7], (dim, qd), jnp.float32),
        "wo":  scale * jax.random.normal(keys[8], (out_dim, qd), jnp.float32),
    }


if __name__ == "__main__":
    B, C, H, W = 2, 8, 16, 16          # dim=8, r=2 -> qkv_dim=4, N=256
    key = jax.random.PRNGKey(0)
    kx, kp = jax.random.split(key)
    x = jax.random.normal(kx, (B, C, H, W), jnp.float32)
    params = _init_params(kp, C, r=2)

    out = jax.block_until_ready(spacial_channel_enhanced_attention_pallas(x, params))
    ref = jax.block_until_ready(_ref_forward(x, params))

    # Slightly relaxed tolerance: kernel uses EUP approximate reciprocals for
    # the softmax / min-max denominators.
    np.testing.assert_allclose(np.asarray(out), np.asarray(ref),
                               rtol=5e-3, atol=5e-3)
    print("KERNEL_OK")
</pallas_src>

<mosaic_0001>
module attributes {stable_mosaic.version = 11 : i64} {
  func.func @_sca_kernel(%arg0: i32, %arg1: memref<1x8x256xf32, #tpu.memory_space<vmem>>, %arg2: memref<28x8xf32, #tpu.memory_space<vmem>>, %arg3: memref<8x4xf32, #tpu.memory_space<vmem>>, %arg4: memref<8x4xf32, #tpu.memory_space<vmem>>, %arg5: memref<1x8x256xf32, #tpu.memory_space<vmem>>) attributes {dimension_semantics = [#tpu.dimension_semantics<parallel>], iteration_bounds = array<i64: 2>, scalar_prefetch = 0 : i64, scratch_operands = 0 : i64, tpu.core_type = #tpu.core_type<tc>, window_params = [{transform_indices = @transform_0, window_bounds = array<i64: 1, 8, 256>}, {pipeline_mode = #tpu.pipeline_mode<synchronous>, transform_indices = @transform_1, window_bounds = array<i64: 28, 8>}, {pipeline_mode = #tpu.pipeline_mode<synchronous>, transform_indices = @transform_2, window_bounds = array<i64: 8, 4>}, {pipeline_mode = #tpu.pipeline_mode<synchronous>, transform_indices = @transform_3, window_bounds = array<i64: 8, 4>}, {transform_indices = @transform_4, window_bounds = array<i64: 1, 8, 256>}]} {
    %c0 = arith.constant 0 : index
    %c0_0 = arith.constant 0 : index
    %c0_1 = arith.constant 0 : index
    %0 = vector.load %arg1[%c0, %c0_0, %c0_1] : memref<1x8x256xf32, #tpu.memory_space<vmem>>, vector<1x8x256xf32>
    %1 = vector.shape_cast %0 : vector<1x8x256xf32> to vector<8x256xf32>
    %c0_2 = arith.constant 0 : index
    %c0_3 = arith.constant 0 : index
    %2 = vector.load %arg2[%c0_2, %c0_3] : memref<28x8xf32, #tpu.memory_space<vmem>>, vector<28x8xf32>
    %cst = arith.constant dense<0.000000e+00> : vector<28x256xf32>
    %3 = tpu.matmul %2, %1, %cst {dimension_numbers = #tpu.dot_dimension_numbers<[1], [0], [0], [1], [0, 0, 1, 1], [], []>} : vector<28x8xf32>, vector<8x256xf32>, vector<28x256xf32> -> vector<28x256xf32>
    %cst_4 = arith.constant 0.000000e+00 : f32
    %4 = vector.broadcast %cst_4 : f32 to vector<28x256xf32>
    %5 = arith.maximumf %3, %4 : vector<28x256xf32>
    %6 = vector.extract_strided_slice %5 {offsets = [0, 0], sizes = [4, 256], strides = [1, 1]} : vector<28x256xf32> to vector<4x256xf32>
    %7 = vector.extract_strided_slice %5 {offsets = [4, 0], sizes = [4, 256], strides = [1, 1]} : vector<28x256xf32> to vector<4x256xf32>
    %8 = vector.extract_strided_slice %5 {offsets = [8, 0], sizes = [4, 256], strides = [1, 1]} : vector<28x256xf32> to vector<4x256xf32>
    %9 = vector.extract_strided_slice %5 {offsets = [12, 0], sizes = [4, 256], strides = [1, 1]} : vector<28x256xf32> to vector<4x256xf32>
    %10 = vector.extract_strided_slice %5 {offsets = [16, 0], sizes = [4, 256], strides = [1, 1]} : vector<28x256xf32> to vector<4x256xf32>
    %11 = vector.extract_strided_slice %5 {offsets = [20, 0], sizes = [4, 256], strides = [1, 1]} : vector<28x256xf32> to vector<4x256xf32>
    %12 = vector.extract_strided_slice %5 {offsets = [24, 0], sizes = [4, 256], strides = [1, 1]} : vector<28x256xf32> to vector<4x256xf32>
    %cst_5 = arith.constant dense<0.000000e+00> : vector<256x256xf32>
    %13 = tpu.matmul %6, %7, %cst_5 {dimension_numbers = #tpu.dot_dimension_numbers<[0], [0], [1], [1], [0, 1, 1, 1], [], []>} : vector<4x256xf32>, vector<4x256xf32>, vector<256x256xf32> -> vector<256x256xf32>
    %cst_6 = arith.constant dense<0xFF800000> : vector<256xf32>
    %14 = vector.multi_reduction <maximumf>, %13, %cst_6 [1] : vector<256x256xf32> to vector<256xf32>
    %15 = vector.shape_cast %14 : vector<256xf32> to vector<256x1xf32>
    %16 = vector.broadcast %15 : vector<256x1xf32> to vector<256x256xf32>
    %17 = arith.subf %13, %16 : vector<256x256xf32>
    %18 = math.exp %17 : vector<256x256xf32>
    %cst_7 = arith.constant dense<0.000000e+00> : vector<256xf32>
    %19 = vector.multi_reduction <add>, %18, %cst_7 [1] : vector<256x256xf32> to vector<256xf32>
    %20 = vector.shape_cast %19 : vector<256xf32> to vector<256x1xf32>
    %21 = tpu.reciprocal %20 {approx = true} : vector<256x1xf32> -> vector<256x1xf32>
    %22 = vector.broadcast %21 : vector<256x1xf32> to vector<256x256xf32>
    %23 = arith.mulf %18, %22 : vector<256x256xf32>
    %cst_8 = arith.constant dense<0.000000e+00> : vector<4x256xf32>
    %24 = tpu.matmul %12, %23, %cst_8 {dimension_numbers = #tpu.dot_dimension_numbers<[1], [1], [0], [0], [0, 0, 1, 0], [], []>} : vector<4x256xf32>, vector<256x256xf32>, vector<4x256xf32> -> vector<4x256xf32>
    %cst_9 = arith.constant dense<0.000000e+00> : vector<256x256xf32>
    %25 = tpu.matmul %8, %9, %cst_9 {dimension_numbers = #tpu.dot_dimension_numbers<[0], [0], [1], [1], [0, 1, 1, 1], [], []>} : vector<4x256xf32>, vector<4x256xf32>, vector<256x256xf32> -> vector<256x256xf32>
    %cst_10 = arith.constant dense<0xFF800000> : vector<256xf32>
    %26 = vector.multi_reduction <maximumf>, %25, %cst_10 [1] : vector<256x256xf32> to vector<256xf32>
    %27 = vector.shape_cast %26 : vector<256xf32> to vector<256x1xf32>
    %28 = vector.broadcast %27 : vector<256x1xf32> to vector<256x256xf32>
    %29 = arith.subf %25, %28 : vector<256x256xf32>
    %30 = math.exp %29 : vector<256x256xf32>
    %cst_11 = arith.constant dense<0.000000e+00> : vector<256xf32>
    %31 = vector.multi_reduction <add>, %30, %cst_11 [1] : vector<256x256xf32> to vector<256xf32>
    %32 = vector.shape_cast %31 : vector<256xf32> to vector<256x1xf32>
    %33 = tpu.reciprocal %32 {approx = true} : vector<256x1xf32> -> vector<256x1xf32>
    %34 = vector.broadcast %33 : vector<256x1xf32> to vector<256x256xf32>
    %35 = arith.mulf %30, %34 : vector<256x256xf32>
    %cst_12 = arith.constant dense<0.000000e+00> : vector<256xf32>
    %36 = vector.multi_reduction <add>, %35, %cst_12 [0] : vector<256x256xf32> to vector<256xf32>
    %37 = vector.shape_cast %36 : vector<256xf32> to vector<1x256xf32>
    %cst_13 = arith.constant dense<0xFF800000> : vector<1xf32>
    %38 = vector.multi_reduction <maximumf>, %37, %cst_13 [1] : vector<1x256xf32> to vector<1xf32>
    %39 = vector.shape_cast %38 : vector<1xf32> to vector<1x1xf32>
    %cst_14 = arith.constant dense<0x7F800000> : vector<1xf32>
    %40 = vector.multi_reduction <minimumf>, %37, %cst_14 [1] : vector<1x256xf32> to vector<1xf32>
    %41 = vector.shape_cast %40 : vector<1xf32> to vector<1x1xf32>
    %42 = vector.broadcast %41 : vector<1x1xf32> to vector<1x256xf32>
    %43 = arith.subf %37, %42 : vector<1x256xf32>
    %44 = arith.subf %39, %41 : vector<1x1xf32>
    %45 = tpu.reciprocal %44 {approx = true} : vector<1x1xf32> -> vector<1x1xf32>
    %46 = vector.broadcast %45 : vector<1x1xf32> to vector<1x256xf32>
    %47 = arith.mulf %43, %46 : vector<1x256xf32>
    %cst_15 = arith.constant dense<0.000000e+00> : vector<4x4xf32>
    %48 = tpu.matmul %10, %11, %cst_15 {dimension_numbers = #tpu.dot_dimension_numbers<[1], [1], [0], [0], [0, 0, 1, 0], [], []>} : vector<4x256xf32>, vector<4x256xf32>, vector<4x4xf32> -> vector<4x4xf32>
    %cst_16 = arith.constant dense<0xFF800000> : vector<4xf32>
    %49 = vector.multi_reduction <maximumf>, %48, %cst_16 [1] : vector<4x4xf32> to vector<4xf32>
    %50 = vector.shape_cast %49 : vector<4xf32> to vector<4x1xf32>
    %51 = vector.broadcast %50 : vector<4x1xf32> to vector<4x4xf32>
    %52 = arith.subf %48, %51 : vector<4x4xf32>
    %53 = math.exp %52 : vector<4x4xf32>
    %cst_17 = arith.constant dense<0.000000e+00> : vector<4xf32>
    %54 = vector.multi_reduction <add>, %53, %cst_17 [1] : vector<4x4xf32> to vector<4xf32>
    %55 = vector.shape_cast %54 : vector<4xf32> to vector<4x1xf32>
    %56 = tpu.reciprocal %55 {approx = true} : vector<4x1xf32> -> vector<4x1xf32>
    %57 = vector.broadcast %56 : vector<4x1xf32> to vector<4x4xf32>
    %58 = arith.mulf %53, %57 : vector<4x4xf32>
    %cst_18 = arith.constant dense<0.000000e+00> : vector<4xf32>
    %59 = vector.multi_reduction <add>, %58, %cst_18 [0] : vector<4x4xf32> to vector<4xf32>
    %60 = vector.shape_cast %59 : vector<4xf32> to vector<1x4xf32>
    %cst_19 = arith.constant dense<0xFF800000> : vector<1xf32>
    %61 = vector.multi_reduction <maximumf>, %60, %cst_19 [1] : vector<1x4xf32> to vector<1xf32>
    %62 = vector.shape_cast %61 : vector<1xf32> to vector<1x1xf32>
    %cst_20 = arith.constant dense<0x7F800000> : vector<1xf32>
    %63 = vector.multi_reduction <minimumf>, %60, %cst_20 [1] : vector<1x4xf32> to vector<1xf32>
    %64 = vector.shape_cast %63 : vector<1xf32> to vector<1x1xf32>
    %65 = vector.broadcast %64 : vector<1x1xf32> to vector<1x4xf32>
    %66 = arith.subf %60, %65 : vector<1x4xf32>
    %67 = arith.subf %62, %64 : vector<1x1xf32>
    %68 = tpu.reciprocal %67 {approx = true} : vector<1x1xf32> -> vector<1x1xf32>
    %69 = vector.broadcast %68 : vector<1x1xf32> to vector<1x4xf32>
    %70 = arith.mulf %66, %69 : vector<1x4xf32>
    %c0_21 = arith.constant 0 : index
    %c0_22 = arith.constant 0 : index
    %71 = vector.load %arg3[%c0_21, %c0_22] : memref<8x4xf32, #tpu.memory_space<vmem>>, vector<8x4xf32>
    %cst_23 = arith.constant dense<0.000000e+00> : vector<8x1xf32>
    %72 = tpu.matmul %71, %70, %cst_23 {dimension_numbers = #tpu.dot_dimension_numbers<[1], [1], [0], [0], [0, 0, 1, 0], [], []>} : vector<8x4xf32>, vector<1x4xf32>, vector<8x1xf32> -> vector<8x1xf32>
    %cst_24 = arith.constant 0.000000e+00 : f32
    %73 = vector.broadcast %cst_24 : f32 to vector<8x1xf32>
    %74 = arith.maximumf %72, %73 : vector<8x1xf32>
    %75 = vector.broadcast %47 : vector<1x256xf32> to vector<8x256xf32>
    %76 = vector.broadcast %74 : vector<8x1xf32> to vector<8x256xf32>
    %77 = arith.addf %75, %76 : vector<8x256xf32>
    %c0_25 = arith.constant 0 : index
    %c0_26 = arith.constant 0 : index
    %78 = vector.load %arg4[%c0_25, %c0_26] : memref<8x4xf32, #tpu.memory_space<vmem>>, vector<8x4xf32>
    %cst_27 = arith.constant dense<0.000000e+00> : vector<8x256xf32>
    %79 = tpu.matmul %78, %24, %cst_27 {dimension_numbers = #tpu.dot_dimension_numbers<[1], [0], [0], [1], [0, 0, 1, 1], [], []>} : vector<8x4xf32>, vector<4x256xf32>, vector<8x256xf32> -> vector<8x256xf32>
    %cst_28 = arith.constant 0.000000e+00 : f32
    %80 = vector.broadcast %cst_28 : f32 to vector<8x256xf32>
    %81 = arith.maximumf %79, %80 : vector<8x256xf32>
    %82 = arith.addf %81, %1 : vector<8x256xf32>
    %83 = arith.mulf %82, %77 : vector<8x256xf32>
    %c0_29 = arith.constant 0 : index
    %c0_30 = arith.constant 0 : index
    %c0_31 = arith.constant 0 : index
    %84 = vector.load %arg5[%c0_29, %c0_30, %c0_31] : memref<1x8x256xf32, #tpu.memory_space<vmem>>, vector<1x8x256xf32>
    %85 = vector.shape_cast %84 : vector<1x8x256xf32> to vector<8x256xf32>
    %86 = vector.shape_cast %83 : vector<8x256xf32> to vector<1x8x256xf32>
    tpu.vector_store %arg5[%c0_29, %c0_30, %c0_31], %86 {strides = array<i32>} : memref<1x8x256xf32, #tpu.memory_space<vmem>>, vector<1x8x256xf32>,
    return
  }
  func.func @transform_0(%arg0: i32) -> (i32, i32, i32) {
    %c0_i32 = arith.constant 0 : i32
    %c0_i32_0 = arith.constant 0 : i32
    %c0_i32_1 = arith.constant 0 : i32
    return %arg0, %c0_i32, %c0_i32_0 : i32, i32, i32
  }
  func.func @transform_1(%arg0: i32) -> (i32, i32) {
    %c0_i32 = arith.constant 0 : i32
    %c0_i32_0 = arith.constant 0 : i32
    %c0_i32_1 = arith.constant 0 : i32
    return %c0_i32, %c0_i32_0 : i32, i32
  }
  func.func @transform_2(%arg0: i32) -> (i32, i32) {
    %c0_i32 = arith.constant 0 : i32
    %c0_i32_0 = arith.constant 0 : i32
    %c0_i32_1 = arith.constant 0 : i32
    return %c0_i32, %c0_i32_0 : i32, i32
  }
  func.func @transform_3(%arg0: i32) -> (i32, i32) {
    %c0_i32 = arith.constant 0 : i32
    %c0_i32_0 = arith.constant 0 : i32
    %c0_i32_1 = arith.constant 0 : i32
    return %c0_i32, %c0_i32_0 : i32, i32
  }
  func.func @transform_4(%arg0: i32) -> (i32, i32, i32) {
    %c0_i32 = arith.constant 0 : i32
    %c0_i32_0 = arith.constant 0 : i32
    %c0_i32_1 = arith.constant 0 : i32
    return %arg0, %c0_i32, %c0_i32_0 : i32, i32, i32
  }
}

</mosaic_0001>

<bundles_post_ra>
// kernel: tpu_custom_call.1
= control target key start
LH: loop header
LB: loop body
LE: loop exit
PB: predicated region body
PF: predicated region fallthrough
CT: control target
= control target key end

     0   :  { %9 = vsyncpa [#allocation3], 0  ;;  %s4569_s0 = inlined_call_operand.vmem [shape: f32[2,8,256], index: 0, kind: input, shape index: {}]   ;;  %s4570_s1 = inlined_call_operand.vmem [shape: f32[28,8], index: 1, kind: input, shape index: {}]   ;;  %s4571_s2 = inlined_call_operand.vmem [shape: f32[8,4], index: 2, kind: input, shape index: {}]   ;;  %s4572_s3 = inlined_call_operand.vmem [shape: f32[8,4], index: 3, kind: input, shape index: {}]   ;;  %s4573_s4 = inlined_call_operand.hbm [shape: f32[2,8,256], index: 4, kind: output, shape index: {}]  }
   0x1   :  { %11 = vsyncpa [#allocation3 + $0x1], 0  ;;  %s3235_s15 = smov 0   ;;  %s3237_s16 = smov 0  }
   0x2   :  { %s3239_s17 = smov 0   ;;  %s3241_s18 = smov 0  }
   0x3 LB: > { %s3256_s19 = sadd.s32 4294967295, %s3206_s18   ;;  %s2557_s20 = sadd.s32 4294967294, %s3206_s18   ;;  %s3206_s18 = sphi %s3241_s18, %s4781_s18   ;;  %s3202_s17 = sphi %s3239_s17, %s4780_s17   ;;  %s3198_s16 = sphi %s3237_s16, %s4779_s16   ;;  %s3194_s15 = sphi %s3235_s15, %s4778_s15  }
   0x4   : > { %s3260_s21 = sadd.s32 1, %s3206_s18   ;;  %s113_s22 = sadd.s32 1, %s3202_s17 }
   0x5   : > { %s110_s23 = ssub.s32 %s3206_s18, %s3260_s21  ;;  %p123_p0 = scmp.ne.s32.totalorder %s3202_s17, %s3198_s16 }
   0x6   : > { %p111_p1 = scmp.eq.s32.totalorder %s110_s23, 0  ;;  %p124_p2 = scmp.eq.s32.totalorder %s3256_s19, 1 }
   0x7   : > { %p129_p3 = scmp.ne.s32.totalorder %s3198_s16, %s3194_s15  ;;  %p130_p4 = scmp.eq.s32.totalorder %s2557_s20, 1 }
   0x8   : > { %s3271_s24 = scalar_select %p111_p1, %s3202_s17, %s113_s22  }
   0x9   : > { %p3273_p5 = por %p124_p2, %p123_p0  ;;  %p3277_p6 = por %p130_p4, %p129_p3 }
   0xa   : > { %p2560_p7 = scmp.ge.s32.totalorder %s3206_s18, 1  ;;  %p165_p8 = scmp.lt.s32.totalorder %s3206_s18, 3 }
   0xc   : > { %p166_p9 = pnand %p2560_p7, %p165_p8 }
   0xe   : > { %169 = sbr.rel (%p166_p9) target bundleno = 1903 (0x76f), region = 36 }
  0x15   : > { %p191_p10 = scmp.lt.s32.totalorder %s3256_s19, 1  ;;  %v4574_v0 = vmov 0.0   ;;  %v198_v3 = vld [vmem:[%s4570_s1] sm:$0xff]  ;;  %vm202_vm0 = vcmask 64512   ;;  %vm477_vm1 = vcmask 1043456   ;;  %vm380_vm2 = vcmask 31744  }
  0x16   : > { %279 = vmatprep.mubr.f32.mxu1 %v4574_v0  ;;  %546 = vmatprep.mubr.f32.mxu0 %v4574_v0  ;;  %v199_v42 = vld [vmem:[%s4570_s1 + $0x8] sm:$0xff]  ;;  %vm2357_vm3 = vcmask 27648   ;;  %s2645_s29 = sshll.u32 %s3256_s19, 8  ;;  %s3209_s10 = smov [#allocation2]  }
  0x17   : > { %s192_s27 = scalar_select %p191_p10, %s3256_s19, 1 }
  0x18   : > { %s4527_s9 = scalar_lea.hbm %s4573_s4, %s2645_s29  ;;  %s3148_s11 = sshll.u32 %s3209_s10, 4  ;;  %s3149_s11 = int_to_ptr.vmem [resolvable:$false] %s3148_s11 }
  0x19   : > { %s2644_s28 = sshll.u32 %s192_s27, 4  ;;  %s188_s27 = sand.u32 1, %s3198_s16  }
  0x1a   : > { %s3290_s5 = scalar_lea.vmem %s4569_s0, %s2644_s28  ;;  %s2561_s28 = sshll.u32 %s188_s27, 4 }
  0x1b   : > { %v197_v1 = vld [vmem:[%s3290_s5 + $0x8] sm:$0xff]  ;;  %v196_v2 = vld [vmem:[%s3290_s5] sm:$0xff]  ;;  %s190_s30 = scalar_lea.vmem [#allocation2], %s2561_s28  ;;  %s3150_s12 = scalar_lea.vmem %s3149_s11, 512 }
  0x1c   : > { %215 = vmatprep.subr.mxu1 %v197_v1  ;;  %s2498_s6 = sshll.u32 %s190_s30, 4  ;;  %s4529_s6 = int_to_ptr.vmem [resolvable:$true] %s2498_s6 }
  0x1d   : > { %216 = vmatpush1.msra.mxu1 %v196_v2  ;;  %s3144_s19 = scalar_lea.vmem %s4529_s6, 256  ;;  %p3151_p0 = scmp.lt.s32.totalorder %s4529_s6, %s3149_s11 }
  0x1e   : > { %2564 = vmatmul.mubr.msk.f32.vlgmr.msra.gmra.mrb[0].mxu1 %vm202_vm0, %v198_v3  ;;  %p3145_p11 = scmp.ne.s32.totalorder %s4529_s6, %s3144_s19  ;;  %p3152_p1 = scmp.lt.s32.totalorder %s3150_s12, %s3144_s19 }
  0x1f   : > { %285 = vmatprep.mubr.f32.mxu1 %v4574_v0 }
  0x20   : > { %p3146_p12 = pnand %p3145_p11, %p3273_p5  ;;  %p3153_p2 = por %p3152_p1, %p3151_p0 }
  0x22   : > { %2565 = vmatmul.mubr.msk.f32.gmra.mrb[2].mxu1 %vm202_vm0, %v199_v42  ;;  %p3147_p13 = pneg %p3146_p12 }
  0x23   : > { %291 = vmatprep.mubr.f32.mxu1 %v4574_v0 }
  0x24   : > { %p3154_p3 = pnand %p3153_p2, %p3147_p13 }
  0xf1   : > { %v281_v4 = vpop.f32.mrb[0].mxu1 }
  0xf2   : > { %v304_v5 = vmax.f32 %v281_v4, 0.0  ;;  %v283_v6 = vpop.f32.mrb[1].mxu1 }
  0xf3   : > { %v305_v7 = vmax.f32 %v283_v6, 0.0 }
  0xf4   : > { %312 = vxpose.xlu0.b32.start.end [1/1] (short) %v304_v5, 128  ;;  %v378_v9 = vrot.slane %v304_v5, 4 }
  0xf5   : > { %v379_v8 = vrot.slane %v305_v7, 4 }
  0xf7   : > { %2568 = vmatprep.subr.msk.mxu0 %vm477_vm1, %v379_v8 }
  0xf8   : > { %2569 = vmatpush1.msk.msra.mxu0 %vm477_vm1, %v378_v9 }
 0x131   : > { %344 = vxpose.xlu0.b32.start.end [1/1] (short) %v305_v7, 128 }
 0x174   : > { %v328_v10 = vpop.trf.xlu0 }
 0x175   : > { %2570 = vmatmul.mubr.msk.f32.vlgmr.msra.gmra.mrb[0].mxu0 %vm380_vm2, %v328_v10 }
 0x176   : > { %552 = vmatprep.mubr.f32.mxu0 %v4574_v0 }
 0x178   : > { %v329_v11 = vpop.trf.xlu0 }
 0x179   : > { %2571 = vmatmul.mubr.msk.f32.gmra.mrb[2].mxu0 %vm380_vm2, %v329_v11 }
 0x17a   : > { %558 = vmatprep.mubr.f32.mxu0 %v4574_v0 }
 0x17c   : > { %v330_v12 = vpop.trf.xlu0 }
 0x17d   : > { %2572 = vmatmul.mubr.msk.f32.gmra.mrb[4].mxu0 %vm380_vm2, %v330_v12 }
 0x17e   : > { %564 = vmatprep.mubr.f32.mxu0 %v4574_v0 }
 0x180   : > { %v331_v13 = vpop.trf.xlu0 }
 0x181   : > { %2573 = vmatmul.mubr.msk.f32.gmra.mrb[6].mxu0 %vm380_vm2, %v331_v13 }
 0x182   : > { %570 = vmatprep.mubr.f32.mxu0 %v4574_v0 }
 0x184   : > { %v332_v14 = vpop.trf.xlu0 }
 0x185   : > { %2574 = vmatmul.mubr.msk.f32.gmra.mrb[8].mxu0 %vm380_vm2, %v332_v14 }
 0x186   : > { %576 = vmatprep.mubr.f32.mxu0 %v4574_v0 }
 0x188   : > { %v333_v15 = vpop.trf.xlu0 }
 0x189   : > { %2575 = vmatmul.mubr.msk.f32.gmra.mrb[10].mxu0 %vm380_vm2, %v333_v15 }
 0x18a   : > { %582 = vmatprep.mubr.f32.mxu0 %v4574_v0 }
 0x18c   : > { %v334_v16 = vpop.trf.xlu0 }
 0x18d   : > { %2576 = vmatmul.mubr.msk.f32.gmra.mrb[12].mxu0 %vm380_vm2, %v334_v16 }
 0x18e   : > { %588 = vmatprep.mubr.f32.mxu0 %v4574_v0 }
 0x190   : > { %v335_v17 = vpop.trf.xlu0 }
 0x191   : > { %2577 = vmatmul.mubr.msk.f32.gmra.mrb[14].mxu0 %vm380_vm2, %v335_v17 }
 0x192   : > { %594 = vmatprep.mubr.f32.mxu0 %v4574_v0 }
 0x194   : > { %v336_v18 = vpop.trf.xlu0 }
 0x195   : > { %2578 = vmatmul.mubr.msk.f32.gmra.mrb[16].mxu0 %vm380_vm2, %v336_v18 }
 0x196   : > { %600 = vmatprep.mubr.f32.mxu0 %v4574_v0 }
 0x198   : > { %v337_v19 = vpop.trf.xlu0 }
 0x199   : > { %2579 = vmatmul.mubr.msk.f32.gmra.mrb[18].mxu0 %vm380_vm2, %v337_v19 }
 0x19a   : > { %606 = vmatprep.mubr.f32.mxu0 %v4574_v0 }
 0x19c   : > { %v338_v20 = vpop.trf.xlu0 }
 0x19d   : > { %2580 = vmatmul.mubr.msk.f32.gmra.mrb[20].mxu0 %vm380_vm2, %v338_v20 }
 0x19e   : > { %612 = vmatprep.mubr.f32.mxu0 %v4574_v0 }
 0x1a0   : > { %v339_v21 = vpop.trf.xlu0 }
 0x1a1   : > { %2581 = vmatmul.mubr.msk.f32.gmra.mrb[22].mxu0 %vm380_vm2, %v339_v21 }
 0x1a2   : > { %618 = vmatprep.mubr.f32.mxu0 %v4574_v0 }
 0x1a4   : > { %v340_v22 = vpop.trf.xlu0 }
 0x1a5   : > { %2582 = vmatmul.mubr.msk.f32.gmra.mrb[24].mxu0 %vm380_vm2, %v340_v22 }
 0x1a6   : > { %624 = vmatprep.mubr.f32.mxu0 %v4574_v0 }
 0x1a8   : > { %v341_v23 = vpop.trf.xlu0 }
 0x1a9   : > { %2583 = vmatmul.mubr.msk.f32.gmra.mrb[26].mxu0 %vm380_vm2, %v341_v23 }
 0x1aa   : > { %630 = vmatprep.mubr.f32.mxu0 %v4574_v0 }
 0x1ac   : > { %v342_v24 = vpop.trf.xlu0 }
 0x1ad   : > { %2584 = vmatmul.mubr.msk.f32.gmra.mrb[28].mxu0 %vm380_vm2, %v342_v24 }
 0x1ae   : > { %636 = vmatprep.mubr.f32.mxu0 %v4574_v0 }
 0x1b0   : > { %v343_v25 = vpop.trf.xlu0 }
 0x1b1   : > { %2585 = vmatmul.mubr.msk.f32.gmra.mrb[30].mxu0 %vm380_vm2, %v343_v25 }
 0x1b2   : > { %642 = vmatprep.mubr.f32.mxu0 %v4574_v0 }
 0x1b4   : > { %v360_v26 = vpop.trf.xlu0 }
 0x1b5   : > { %2586 = vmatmul.mubr.msk.f32.gmra.mrb[32].mxu0 %vm380_vm2, %v360_v26 }
 0x1b6   : > { %648 = vmatprep.mubr.f32.mxu0 %v4574_v0 }
 0x1b8   : > { %v361_v27 = vpop.trf.xlu0 }
 0x1b9   : > { %2587 = vmatmul.mubr.msk.f32.gmra.mrb[34].mxu0 %vm380_vm2, %v361_v27 }
 0x1ba   : > { %654 = vmatprep.mubr.f32.mxu0 %v4574_v0 }
 0x1bc   : > { %v362_v28 = vpop.trf.xlu0 }
 0x1bd   : > { %2588 = vmatmul.mubr.msk.f32.gmra.mrb[36].mxu0 %vm380_vm2, %v362_v28 }
 0x1be   : > { %660 = vmatprep.mubr.f32.mxu0 %v4574_v0 }
 0x1c0   : > { %v363_v29 = vpop.trf.xlu0 }
 0x1c1   : > { %2589 = vmatmul.mubr.msk.f32.gmra.mrb[38].mxu0 %vm380_vm2, %v363_v29 }
 0x1c2   : > { %666 = vmatprep.mubr.f32.mxu0 %v4574_v0 }
 0x1c4   : > { %v364_v30 = vpop.trf.xlu0 }
 0x1c5   : > { %2590 = vmatmul.mubr.msk.f32.gmra.mrb[40].mxu0 %vm380_vm2, %v364_v30 }
 0x1c6   : > { %672 = vmatprep.mubr.f32.mxu0 %v4574_v0 }
 0x1c8   : > { %v365_v31 = vpop.trf.xlu0 }
 0x1c9   : > { %2591 = vmatmul.mubr.msk.f32.gmra.mrb[42].mxu0 %vm380_vm2, %v365_v31 }
 0x1ca   : > { %678 = vmatprep.mubr.f32.mxu0 %v4574_v0 }
 0x1cc   : > { %v366_v32 = vpop.trf.xlu0 }
 0x1cd   : > { %2592 = vmatmul.mubr.msk.f32.gmra.mrb[44].mxu0 %vm380_vm2, %v366_v32 }
 0x1ce   : > { %684 = vmatprep.mubr.f32.mxu0 %v4574_v0 }
 0x1d0   : > { %v367_v33 = vpop.trf.xlu0 }
 0x1d1   : > { %2593 = vmatmul.mubr.msk.f32.gmra.mrb[46].mxu0 %vm380_vm2, %v367_v33 }
 0x1d2   : > { %690 = vmatprep.mubr.f32.mxu0 %v4574_v0 }
 0x1d4   : > { %v368_v34 = vpop.trf.xlu0 }
 0x1d5   : > { %2594 = vmatmul.mubr.msk.f32.gmra.mrb[48].mxu0 %vm380_vm2, %v368_v34 }
 0x1d6   : > { %696 = vmatprep.mubr.f32.mxu0 %v4574_v0 }
 0x1d8   : > { %v369_v35 = vpop.trf.xlu0 }
 0x1d9   : > { %2595 = vmatmul.mubr.msk.f32.gmra.mrb[50].mxu0 %vm380_vm2, %v369_v35 }
 0x1da   : > { %702 = vmatprep.mubr.f32.mxu0 %v4574_v0 }
 0x1dc   : > { %v370_v36 = vpop.trf.xlu0 }
 0x1dd   : > { %2596 = vmatmul.mubr.msk.f32.gmra.mrb[52].mxu0 %vm380_vm2, %v370_v36 }
 0x1de   : > { %708 = vmatprep.mubr.f32.mxu0 %v4574_v0 }
 0x1e0   : > { %v371_v37 = vpop.trf.xlu0 }
 0x1e1   : > { %2597 = vmatmul.mubr.msk.f32.gmra.mrb[54].mxu0 %vm380_vm2, %v371_v37 }
 0x1e2   : > { %714 = vmatprep.mubr.f32.mxu0 %v4574_v0 }
 0x1e4   : > { %v372_v38 = vpop.trf.xlu0 }
 0x1e5   : > { %2598 = vmatmul.mubr.msk.f32.gmra.mrb[56].mxu0 %vm380_vm2, %v372_v38 }
 0x1e6   : > { %720 = vmatprep.mubr.f32.mxu0 %v4574_v0 }
 0x1e8   : > { %v373_v39 = vpop.trf.xlu0 }
 0x1e9   : > { %2599 = vmatmul.mubr.msk.f32.gmra.mrb[58].mxu0 %vm380_vm2, %v373_v39 }
 0x1ea   : > { %726 = vmatprep.mubr.f32.mxu0 %v4574_v0 }
 0x1ec   : > { %v374_v40 = vpop.trf.xlu0 }
 0x1ed   : > { %2600 = vmatmul.mubr.msk.f32.gmra.mrb[60].mxu0 %vm380_vm2, %v374_v40 }
 0x1ee   : > { %732 = vmatprep.mubr.f32.mxu0 %v4574_v0 }
 0x1f0   : > { %v375_v41 = vpop.trf.xlu0 }
 0x1f1   : > { %2601 = vmatmul.mubr.msk.f32.gmra.mrb[62].mxu0 %vm380_vm2, %v375_v41 }
 0x248   : > { %v3369_v43 = vpop.f32.mrb[0].mxu0 }
 0x249   : > { %v3371_v44 = vpop.f32.mrb[1].mxu0 }
 0x24a   : > { %v739_v45 = vmax.f32 %v3369_v43, %v3371_v44 }
 0x24c   : > { %740 = vmax.xlane.f32.xlu1 %v739_v45  ;;  %v3375_v46 = vpop.f32.mrb[2].mxu0 }
 0x24d   : > { %v3377_v47 = vpop.f32.mrb[3].mxu0 }
 0x24e   : > { %v742_v48 = vmax.f32 %v3375_v46, %v3377_v47 }
 0x250   : > { %743 = vmax.xlane.f32.xlu1 %v742_v48  ;;  %v3381_v49 = vpop.f32.mrb[4].mxu0 }
 0x251   : > { %v3383_v50 = vpop.f32.mrb[5].mxu0 }
 0x252   : > { %v745_v51 = vmax.f32 %v3381_v49, %v3383_v50 }
 0x254   : > { %746 = vmax.xlane.f32.xlu1 %v745_v51  ;;  %v3387_v52 = vpop.f32.mrb[6].mxu0 }
 0x255   : > { %v3389_v53 = vpop.f32.mrb[7].mxu0 }
 0x256   : > { %v748_v54 = vmax.f32 %v3387_v52, %v3389_v53 }
 0x258   : > { %749 = vmax.xlane.f32.xlu1 %v748_v54  ;;  %v3393_v55 = vpop.f32.mrb[8].mxu0 }
 0x259   : > { %v3395_v56 = vpop.f32.mrb[9].mxu0 }
 0x25a   : > { %v751_v57 = vmax.f32 %v3393_v55, %v3395_v56 }
 0x25c   : > { %752 = vmax.xlane.f32.xlu1 %v751_v57  ;;  %v3399_v58 = vpop.f32.mrb[10].mxu0 }
 0x25d   : > { %v3401_v59 = vpop.f32.mrb[11].mxu0 }
 0x25e   : > { %v754_v60 = vmax.f32 %v3399_v58, %v3401_v59 }
 0x260   : > { %755 = vmax.xlane.f32.xlu1 %v754_v60  ;;  %v3405_v61 = vpop.f32.mrb[12].mxu0 }
 0x261   : > { %v3407_v62 = vpop.f32.mrb[13].mxu0 }
 0x262   : > { %v757_v63 = vmax.f32 %v3405_v61, %v3407_v62 }
 0x264   : > { %758 = vmax.xlane.f32.xlu1 %v757_v63  ;;  %v3411_v1 = vpop.f32.mrb[14].mxu0 }
 0x265   : > { %v3413_v2 = vpop.f32.mrb[15].mxu0 }
 0x266   : > { %v760_v3 = vmax.f32 %v3411_v1, %v3413_v2 }
 0x268   : > { %761 = vmax.xlane.f32.xlu1 %v760_v3  ;;  %v3417_v4 = vpop.f32.mrb[16].mxu0 }
 0x269   : > { %v3419_v5 = vpop.f32.mrb[17].mxu0 }
 0x26a   : > { %v763_v6 = vmax.f32 %v3417_v4, %v3419_v5 }
 0x26c   : > { %764 = vmax.xlane.f32.xlu1 %v763_v6  ;;  %v3423_v7 = vpop.f32.mrb[18].mxu0 }
 0x26d   : > { %v3425_v8 = vpop.f32.mrb[19].mxu0 }
 0x26e   : > { %v766_v9 = vmax.f32 %v3423_v7, %v3425_v8 }
 0x270   : > { %767 = vmax.xlane.f32.xlu1 %v766_v9  ;;  %v3429_v10 = vpop.f32.mrb[20].mxu0 }
 0x271   : > { %v3431_v11 = vpop.f32.mrb[21].mxu0 }
 0x272   : > { %v769_v12 = vmax.f32 %v3429_v10, %v3431_v11 }
 0x274   : > { %770 = vmax.xlane.f32.xlu1 %v769_v12  ;;  %v3435_v13 = vpop.f32.mrb[22].mxu0 }
 0x275   : > { %v3437_v14 = vpop.f32.mrb[23].mxu0 }
 0x276   : > { %v772_v15 = vmax.f32 %v3435_v13, %v3437_v14 }
 0x278   : > { %773 = vmax.xlane.f32.xlu1 %v772_v15  ;;  %v3441_v16 = vpop.f32.mrb[24].mxu0 }
 0x279   : > { %v3443_v17 = vpop.f32.mrb[25].mxu0 }
 0x27a   : > { %v775_v18 = vmax.f32 %v3441_v16, %v3443_v17 }
 0x27c   : > { %776 = vmax.xlane.f32.xlu1 %v775_v18  ;;  %v3447_v19 = vpop.f32.mrb[26].mxu0 }
 0x27d   : > { %v3449_v20 = vpop.f32.mrb[27].mxu0 }
 0x27e   : > { %v778_v21 = vmax.f32 %v3447_v19, %v3449_v20 }
 0x280   : > { %779 = vmax.xlane.f32.xlu1 %v778_v21  ;;  %v3453_v22 = vpop.f32.mrb[28].mxu0 }
 0x281   : > { %v3455_v23 = vpop.f32.mrb[29].mxu0 }
 0x282   : > { %v781_v24 = vmax.f32 %v3453_v22, %v3455_v23 }
 0x284   : > { %782 = vmax.xlane.f32.xlu1 %v781_v24  ;;  %v3459_v25 = vpop.f32.mrb[30].mxu0 }
 0x285   : > { %v3461_v26 = vpop.f32.mrb[31].mxu0 }
 0x286   : > { %v784_v27 = vmax.f32 %v3459_v25, %v3461_v26 }
 0x288   : > { %785 = vmax.xlane.f32.xlu1 %v784_v27  ;;  %v3465_v28 = vpop.f32.mrb[32].mxu0  ;;  %v200_v27 = vld [vmem:[%s4570_s1 + $0x10] sm:$0xff] }
 0x289   : > { %v3467_v29 = vpop.f32.mrb[33].mxu0  ;;  %2566 = vmatmul.mubr.msk.f32.gmra.mrb[4].mxu1 %vm202_vm0, %v200_v27 }
 0x28a   : > { %v787_v30 = vmax.f32 %v3465_v28, %v3467_v29  ;;  %297 = vmatprep.mubr.f32.mxu1 %v4574_v0 }
 0x28c   : > { %788 = vmax.xlane.f32.xlu1 %v787_v30  ;;  %v3471_v31 = vpop.f32.mrb[34].mxu0 }
 0x28d   : > { %v3473_v32 = vpop.f32.mrb[35].mxu0 }
 0x28e   : > { %v790_v33 = vmax.f32 %v3471_v31, %v3473_v32 }
 0x290   : > { %791 = vmax.xlane.f32.xlu0 %v790_v33  ;;  %v3477_v34 = vpop.f32.mrb[36].mxu0 }
 0x291   : > { %v3479_v35 = vpop.f32.mrb[37].mxu0 }
 0x292   : > { %v793_v36 = vmax.f32 %v3477_v34, %v3479_v35 }
 0x294   : > { %794 = vmax.xlane.f32.xlu1 %v793_v36  ;;  %v3483_v37 = vpop.f32.mrb[38].mxu0 }
 0x295   : > { %v3485_v38 = vpop.f32.mrb[39].mxu0 }
 0x296   : > { %v796_v39 = vmax.f32 %v3483_v37, %v3485_v38 }
 0x298   : > { %797 = vmax.xlane.f32.xlu1 %v796_v39  ;;  %v3489_v40 = vpop.f32.mrb[40].mxu0  ;;  %v201_v39 = vld [vmem:[%s4570_s1 + $0x18] sm:$0xf] }
 0x299   : > { %v3491_v41 = vpop.f32.mrb[41].mxu0  ;;  %2567 = vmatmul.mubr.msk.f32.gmra.mrb[6].mxu1 %vm202_vm0, %v201_v39 }
 0x29a   : > { %v799_v42 = vmax.f32 %v3489_v40, %v3491_v41  ;;  %1522 = vmatprep.mubr.f32.mxu1 %v4574_v0 }
 0x29c   : > { %800 = vmax.xlane.f32.xlu1 %v799_v42  ;;  %v3495_v45 = vpop.f32.mrb[42].mxu0 }
 0x29d   : > { %v3497_v48 = vpop.f32.mrb[43].mxu0 }
 0x29e   : > { %v802_v51 = vmax.f32 %v3495_v45, %v3497_v48 }
 0x2a0   : > { %803 = vmax.xlane.f32.xlu1 %v802_v51  ;;  %v3501_v54 = vpop.f32.mrb[44].mxu0 }
 0x2a1   : > { %v3503_v57 = vpop.f32.mrb[45].mxu0 }
 0x2a2   : > { %v805_v60 = vmax.f32 %v3501_v54, %v3503_v57 }
 0x2a4   : > { %806 = vmax.xlane.f32.xlu1 %v805_v60  ;;  %v3507_v63 = vpop.f32.mrb[46].mxu0 }
 0x2a5   : > { %v3509_v3 = vpop.f32.mrb[47].mxu0 }
 0x2a6   : > { %v808_v6 = vmax.f32 %v3507_v63, %v3509_v3 }
 0x2a8   : > { %809 = vmax.xlane.f32.xlu1 %v808_v6  ;;  %v3513_v9 = vpop.f32.mrb[48].mxu0 }
 0x2a9   : > { %v3515_v12 = vpop.f32.mrb[49].mxu0 }
 0x2aa   : > { %v811_v15 = vmax.f32 %v3513_v9, %v3515_v12 }
 0x2ac   : > { %812 = vmax.xlane.f32.xlu1 %v811_v15  ;;  %v3519_v18 = vpop.f32.mrb[50].mxu0 }
 0x2ad   : > { %4643 = vst [vmem:[#allocation5_spill] sm:$0xff] %v3519_v18  ;;  %v3521_v21 = vpop.f32.mrb[51].mxu0 }
 0x2ae   : > { %4644 = vst [vmem:[#allocation6_spill] sm:$0xff] %v3521_v21  ;;  %v814_v24 = vmax.f32 %v3519_v18, %v3521_v21 }
 0x2b0   : > { %815 = vmax.xlane.f32.xlu1 %v814_v24  ;;  %v3528_v30 = vpop.f32.mrb[52].mxu0 }
 0x2b1   : > { %4645 = vst [vmem:[#allocation7_spill] sm:$0xff] %v3528_v30  ;;  %v3531_v33 = vpop.f32.mrb[53].mxu0 }
 0x2b2   : > { %4646 = vst [vmem:[#allocation8_spill] sm:$0xff] %v3531_v33  ;;  %v817_v36 = vmax.f32 %v3528_v30, %v3531_v33 }
 0x2b4   : > { %818 = vmax.xlane.f32.xlu1 %v817_v36  ;;  %v3539_v42 = vpop.f32.mrb[54].mxu0 }
 0x2b5   : > { %4647 = vst [vmem:[#allocation9_spill] sm:$0xff] %v3539_v42  ;;  %v3542_v51 = vpop.f32.mrb[55].mxu0 }
 0x2b6   : > { %4648 = vst [vmem:[#allocation10_spill] sm:$0xff] %v3542_v51  ;;  %v820_v60 = vmax.f32 %v3539_v42, %v3542_v51 }
 0x2b8   : > { %821 = vmax.xlane.f32.xlu1 %v820_v60  ;;  %v3547_v6 = vpop.f32.mrb[56].mxu0 }
 0x2b9   : > { %4649 = vst [vmem:[#allocation11_spill] sm:$0xff] %v3547_v6  ;;  %v3549_v15 = vpop.f32.mrb[57].mxu0 }
 0x2ba   : > { %4650 = vst [vmem:[#allocation12_spill] sm:$0xff] %v3549_v15  ;;  %v823_v24 = vmax.f32 %v3547_v6, %v3549_v15 }
 0x2bc   : > { %824 = vmax.xlane.f32.xlu1 %v823_v24  ;;  %v3553_v27 = vpop.f32.mrb[58].mxu0 }
 0x2bd   : > { %4651 = vst [vmem:[#allocation13_spill] sm:$0xff] %v3553_v27  ;;  %v3555_v36 = vpop.f32.mrb[59].mxu0 }
 0x2be   : > { %4652 = vst [vmem:[#allocation14_spill] sm:$0xff] %v3555_v36  ;;  %v826_v39 = vmax.f32 %v3553_v27, %v3555_v36 }
 0x2c0   : > { %827 = vmax.xlane.f32.xlu1 %v826_v39  ;;  %v3559_v0 = vpop.f32.mrb[60].mxu0 }
 0x2c1   : > { %4653 = vst [vmem:[#allocation15_spill] sm:$0xff] %v3559_v0  ;;  %v3561_v51 = vpop.f32.mrb[61].mxu0 }
 0x2c2   : > { %4654 = vst [vmem:[#allocation16_spill] sm:$0xff] %v3561_v51  ;;  %v829_v60 = vmax.f32 %v3559_v0, %v3561_v51 }
 0x2c4   : > { %830 = vmax.xlane.f32.xlu1 %v829_v60  ;;  %v3565_v42 = vpop.f32.mrb[62].mxu0 }
 0x2c5   : > { %v3567_v15 = vpop.f32.mrb[63].mxu0 }
 0x2c6   : > { %4655 = vst [vmem:[#allocation17_spill] sm:$0xff] %v3567_v15  ;;  %v832_v24 = vmax.f32 %v3565_v42, %v3567_v15 }
 0x2c8   : > { %833 = vmax.xlane.f32.xlu1 %v832_v24 }
 0x2d9   : > { %v741_v6 = vpop.xlane.xlu1 %740 }
 0x2da   : > { %v835_v36 = vsub.f32 %v3369_v43, %v741_v6  ;;  %v836_v39 = vsub.f32 %v3371_v44, %v741_v6 }
 0x2dc   : > { %v899_v27 = vmul.f32 1.442695, %v835_v36  ;;  %v901_v33 = vmul.f32 1.442695, %v836_v39 }
 0x2dd   : > { %v744_v30 = vpop.xlane.xlu1 %743 }
 0x2de   : > { %2750 = vpow2.f32 %v899_v27  ;;  %v837_v51 = vsub.f32 %v3375_v46, %v744_v30  ;;  %v838_v60 = vsub.f32 %v3377_v47, %v744_v30 }
 0x2df   : > { %2752 = vpow2.f32 %v901_v33 }
 0x2e0   : > { %v903_v0 = vmul.f32 1.442695, %v837_v51  ;;  %v905_v21 = vmul.f32 1.442695, %v838_v60 }
 0x2e1   : > { %v747_v18 = vpop.xlane.xlu1 %746 }
 0x2e2   : > { %2754 = vpow2.f32 %v903_v0  ;;  %v839_v24 = vsub.f32 %v3381_v49, %v747_v18  ;;  %v840_v15 = vsub.f32 %v3383_v50, %v747_v18 }
 0x2e3   : > { %2756 = vpow2.f32 %v905_v21 }
 0x2e4   : > { %v907_v43 = vmul.f32 1.442695, %v839_v24  ;;  %v909_v44 = vmul.f32 1.442695, %v840_v15 }
 0x2e5   : > { %v750_v6 = vpop.xlane.xlu1 %749 }
 0x2e6   : > { %2758 = vpow2.f32 %v907_v43  ;;  %v841_v27 = vsub.f32 %v3387_v52, %v750_v6  ;;  %v842_v46 = vsub.f32 %v3389_v53, %v750_v6 }
 0x2e7   : > { %2760 = vpow2.f32 %v909_v44 }
 0x2e8   : > { %v3579_v47 = vpop.eup %2750  ;;  %v911_v30 = vmul.f32 1.442695, %v841_v27  ;;  %v913_v33 = vmul.f32 1.442695, %v842_v46 }
 0x2e9   : > { %v3581_v51 = vpop.eup %2752  ;;  %v753_v0 = vpop.xlane.xlu1 %752 }
 0x2ea   : > { %2762 = vpow2.f32 %v911_v30  ;;  %v843_v49 = vsub.f32 %v3393_v55, %v753_v0  ;;  %v844_v50 = vsub.f32 %v3395_v56, %v753_v0  ;;  %v1027_v18 = vadd.f32 %v3581_v51, %v3579_v47 }
 0x2eb   : > { %2764 = vpow2.f32 %v913_v33 }
 0x2ec   : > { %v3587_v52 = vpop.eup %2754  ;;  %v915_v53 = vmul.f32 1.442695, %v843_v49  ;;  %v917_v21 = vmul.f32 1.442695, %v844_v50  ;;  %1028 = vadd.xlane.f32.xlu1 %v1027_v18 }
 0x2ed   : > { %v3589_v15 = vpop.eup %2756  ;;  %v756_v36 = vpop.xlane.xlu1 %755 }
 0x2ee   : > { %2766 = vpow2.f32 %v915_v53  ;;  %v845_v39 = vsub.f32 %v3399_v58, %v756_v36  ;;  %v846_v60 = vsub.f32 %v3401_v59, %v756_v36  ;;  %v1030_v55 = vadd.f32 %v3589_v15, %v3587_v52 }
 0x2ef   : > { %2768 = vpow2.f32 %v917_v21 }
 0x2f0   : > { %v3595_v56 = vpop.eup %2758  ;;  %v919_v24 = vmul.f32 1.442695, %v845_v39  ;;  %v921_v43 = vmul.f32 1.442695, %v846_v60  ;;  %1031 = vadd.xlane.f32.xlu1 %v1030_v55 }
 0x2f1   : > { %v3597_v44 = vpop.eup %2760  ;;  %v759_v6 = vpop.xlane.xlu1 %758 }
 0x2f2   : > { %2770 = vpow2.f32 %v919_v24  ;;  %v847_v27 = vsub.f32 %v3405_v61, %v759_v6  ;;  %v848_v46 = vsub.f32 %v3407_v62, %v759_v6  ;;  %v1033_v58 = vadd.f32 %v3597_v44, %v3595_v56 }
 0x2f3   : > { %2772 = vpow2.f32 %v921_v43 }
 0x2f4   : > { %v3603_v59 = vpop.eup %2762  ;;  %v923_v30 = vmul.f32 1.442695, %v847_v27  ;;  %v925_v33 = vmul.f32 1.442695, %v848_v46  ;;  %1034 = vadd.xlane.f32.xlu1 %v1033_v58 }
 0x2f5   : > { %v3605_v0 = vpop.eup %2764  ;;  %v762_v49 = vpop.xlane.xlu1 %761 }
 0x2f6   : > { %2774 = vpow2.f32 %v923_v30  ;;  %v849_v50 = vsub.f32 %v3411_v1, %v762_v49  ;;  %v850_v18 = vsub.f32 %v3413_v2, %v762_v49  ;;  %v1036_v61 = vadd.f32 %v3605_v0, %v3603_v59 }
 0x2f7   : > { %2776 = vpow2.f32 %v925_v33 }
 0x2f8   : > { %v3611_v62 = vpop.eup %2766  ;;  %v927_v53 = vmul.f32 1.442695, %v849_v50  ;;  %v929_v21 = vmul.f32 1.442695, %v850_v18  ;;  %1037 = vadd.xlane.f32.xlu1 %v1036_v61 }
 0x2f9   : > { %v3613_v36 = vpop.eup %2768  ;;  %v765_v39 = vpop.xlane.xlu1 %764 }
 0x2fa   : > { %2778 = vpow2.f32 %v927_v53  ;;  %v851_v60 = vsub.f32 %v3417_v4, %v765_v39  ;;  %v852_v55 = vsub.f32 %v3419_v5, %v765_v39  ;;  %v1039_v1 = vadd.f32 %v3613_v36, %v3611_v62 }
 0x2fb   : > { %2780 = vpow2.f32 %v929_v21 }
 0x2fc   : > { %v3619_v2 = vpop.eup %2770  ;;  %v931_v24 = vmul.f32 1.442695, %v851_v60  ;;  %v933_v43 = vmul.f32 1.442695, %v852_v55  ;;  %1040 = vadd.xlane.f32.xlu1 %v1039_v1 }
 0x2fd   : > { %v3621_v6 = vpop.eup %2772  ;;  %v768_v27 = vpop.xlane.xlu1 %767 }
 0x2fe   : > { %2782 = vpow2.f32 %v931_v24  ;;  %v853_v46 = vsub.f32 %v3423_v7, %v768_v27  ;;  %v854_v58 = vsub.f32 %v3425_v8, %v768_v27  ;;  %v1042_v4 = vadd.f32 %v3621_v6, %v3619_v2 }
 0x2ff   : > { %2784 = vpow2.f32 %v933_v43 }
 0x300   : > { %v3627_v5 = vpop.eup %2774  ;;  %v935_v30 = vmul.f32 1.442695, %v853_v46  ;;  %v937_v33 = vmul.f32 1.442695, %v854_v58  ;;  %1043 = vadd.xlane.f32.xlu1 %v1042_v4 }
 0x301   : > { %v3629_v49 = vpop.eup %2776  ;;  %v771_v50 = vpop.xlane.xlu1 %770 }
 0x302   : > { %2786 = vpow2.f32 %v935_v30  ;;  %v855_v18 = vsub.f32 %v3429_v10, %v771_v50  ;;  %v856_v61 = vsub.f32 %v3431_v11, %v771_v50  ;;  %v1045_v7 = vadd.f32 %v3629_v49, %v3627_v5 }
 0x303   : > { %2788 = vpow2.f32 %v937_v33 }
 0x304   : > { %v3635_v8 = vpop.eup %2778  ;;  %v939_v53 = vmul.f32 1.442695, %v855_v18  ;;  %v941_v21 = vmul.f32 1.442695, %v856_v61  ;;  %1046 = vadd.xlane.f32.xlu1 %v1045_v7 }
 0x305   : > { %v3637_v39 = vpop.eup %2780  ;;  %v774_v60 = vpop.xlane.xlu1 %773 }
 0x306   : > { %2790 = vpow2.f32 %v939_v53  ;;  %v857_v55 = vsub.f32 %v3435_v13, %v774_v60  ;;  %v858_v1 = vsub.f32 %v3437_v14, %v774_v60  ;;  %v1048_v10 = vadd.f32 %v3637_v39, %v3635_v8 }
 0x307   : > { %2792 = vpow2.f32 %v941_v21 }
 0x308   : > { %v3643_v11 = vpop.eup %2782  ;;  %v943_v24 = vmul.f32 1.442695, %v857_v55  ;;  %v945_v43 = vmul.f32 1.442695, %v858_v1  ;;  %1049 = vadd.xlane.f32.xlu1 %v1048_v10 }
 0x309   : > { %v3645_v27 = vpop.eup %2784  ;;  %v777_v46 = vpop.xlane.xlu1 %776 }
 0x30a   : > { %2794 = vpow2.f32 %v943_v24  ;;  %v859_v58 = vsub.f32 %v3441_v16, %v777_v46  ;;  %v860_v4 = vsub.f32 %v3443_v17, %v777_v46  ;;  %v1051_v13 = vadd.f32 %v3645_v27, %v3643_v11  ;;  %v3659_v17 = vpop.f32.mrb[2].mxu1 }
 0x30b   : > { %2796 = vpow2.f32 %v945_v43 }
 0x30c   : > { %v3651_v14 = vpop.eup %2786  ;;  %v947_v30 = vmul.f32 1.442695, %v859_v58  ;;  %v949_v33 = vmul.f32 1.442695, %v860_v4  ;;  %1052 = vadd.xlane.f32.xlu1 %v1051_v13 }
 0x30d   : > { %v3653_v50 = vpop.eup %2788  ;;  %v780_v18 = vpop.xlane.xlu1 %779 }
 0x30e   : > { %2798 = vpow2.f32 %v947_v30  ;;  %v861_v61 = vsub.f32 %v3447_v19, %v780_v18  ;;  %v862_v7 = vsub.f32 %v3449_v20, %v780_v18  ;;  %v1054_v16 = vadd.f32 %v3653_v50, %v3651_v14 }
 0x30f   : > { %2800 = vpow2.f32 %v949_v33 }
 0x310   : > { %v3661_v53 = vpop.eup %2790  ;;  %v951_v21 = vmul.f32 1.442695, %v861_v61  ;;  %v953_v60 = vmul.f32 1.442695, %v862_v7  ;;  %1055 = vadd.xlane.f32.xlu1 %v1054_v16 }
 0x311   : > { %v3663_v55 = vpop.eup %2792  ;;  %v783_v1 = vpop.xlane.xlu1 %782 }
 0x312   : > { %2802 = vpow2.f32 %v951_v21  ;;  %v863_v10 = vsub.f32 %v3453_v22, %v783_v1  ;;  %v864_v19 = vsub.f32 %v3455_v23, %v783_v1  ;;  %v1057_v20 = vadd.f32 %v3663_v55, %v3661_v53 }
 0x313   : > { %2804 = vpow2.f32 %v953_v60 }
 0x314   : > { %v3669_v24 = vpop.eup %2794  ;;  %v955_v43 = vmul.f32 1.442695, %v863_v10  ;;  %v957_v46 = vmul.f32 1.442695, %v864_v19  ;;  %1058 = vadd.xlane.f32.xlu1 %v1057_v20  ;;  %v4590_v20 = vmax.f32 %v3659_v17, 0.0 }
 0x315   : > { %v3671_v58 = vpop.eup %2796  ;;  %v786_v4 = vpop.xlane.xlu1 %785 }
 0x316   : > { %2806 = vpow2.f32 %v955_v43  ;;  %v865_v13 = vsub.f32 %v3459_v25, %v786_v4  ;;  %v866_v30 = vsub.f32 %v3461_v26, %v786_v4  ;;  %v1060_v22 = vadd.f32 %v3671_v58, %v3669_v24 }
 0x317   : > { %2808 = vpow2.f32 %v957_v46  ;;  %v3694_v46 = vpop.f32.mrb[3].mxu1 }
 0x318   : > { %v3677_v23 = vpop.eup %2798  ;;  %v959_v33 = vmul.f32 1.442695, %v865_v13  ;;  %v961_v18 = vmul.f32 1.442695, %v866_v30  ;;  %1061 = vadd.xlane.f32.xlu1 %v1060_v22  ;;  %v4589_v4 = vmax.f32 %v3694_v46, 0.0 }
 0x319   : > { %v3679_v61 = vpop.eup %2800  ;;  %v789_v7 = vpop.xlane.xlu1 %788 }
 0x31a   : > { %2810 = vpow2.f32 %v959_v33  ;;  %v867_v16 = vsub.f32 %v3465_v28, %v789_v7  ;;  %v868_v21 = vsub.f32 %v3467_v29, %v789_v7  ;;  %v1063_v25 = vadd.f32 %v3679_v61, %v3677_v23 }
 0x31b   : > { %2812 = vpow2.f32 %v961_v18  ;;  %v1356_v33 = vrot.slane %v4590_v20, 4 }
 0x31c   : > { %v3685_v26 = vpop.eup %2802  ;;  %v963_v60 = vmul.f32 1.442695, %v867_v16  ;;  %v965_v1 = vmul.f32 1.442695, %v868_v21  ;;  %1064 = vadd.xlane.f32.xlu0 %v1063_v25 }
 0x31d   : > { %v3687_v10 = vpop.eup %2804  ;;  %v792_v19 = vpop.xlane.xlu0 %791 }
 0x31e   : > { %2814 = vpow2.f32 %v963_v60  ;;  %v869_v43 = vsub.f32 %v3471_v31, %v792_v19  ;;  %v870_v28 = vsub.f32 %v3473_v32, %v792_v19  ;;  %v1066_v29 = vadd.f32 %v3687_v10, %v3685_v26 }
 0x31f   : > { %2816 = vpow2.f32 %v965_v1  ;;  %v1357_v32 = vrot.slane %v4589_v4, 4 }
 0x320   : > { %v3697_v13 = vpop.eup %2806  ;;  %v967_v30 = vmul.f32 1.442695, %v869_v43  ;;  %v969_v22 = vmul.f32 1.442695, %v870_v28  ;;  %1067 = vadd.xlane.f32.xlu1 %v1066_v29 }
 0x321   : > { %v3701_v18 = vpop.eup %2808  ;;  %v795_v31 = vpop.xlane.xlu1 %794  ;;  %2602 = vmatprep.subr.msk.mxu1 %vm477_vm1, %v1357_v32 }
 0x322   : > { %2818 = vpow2.f32 %v967_v30  ;;  %v871_v7 = vsub.f32 %v3477_v34, %v795_v31  ;;  %v872_v16 = vsub.f32 %v3479_v35, %v795_v31  ;;  %v1069_v21 = vadd.f32 %v3701_v18, %v3697_v13  ;;  %2603 = vmatpush1.msk.msra.mxu1 %vm477_vm1, %v1356_v33 }
 0x323   : > { %2820 = vpow2.f32 %v969_v22 }
 0x324   : > { %v3710_v25 = vpop.eup %2810  ;;  %v971_v60 = vmul.f32 1.442695, %v871_v7  ;;  %v973_v1 = vmul.f32 1.442695, %v872_v16  ;;  %1070 = vadd.xlane.f32.xlu0 %v1069_v21 }
 0x325   : > { %v3713_v19 = vpop.eup %2812  ;;  %v798_v43 = vpop.xlane.xlu1 %797 }
 0x326   : > { %2822 = vpow2.f32 %v971_v60  ;;  %v873_v34 = vsub.f32 %v3483_v37, %v798_v43  ;;  %v874_v35 = vsub.f32 %v3485_v38, %v798_v43  ;;  %v1072_v28 = vadd.f32 %v3713_v19, %v3710_v25 }
 0x327   : > { %2824 = vpow2.f32 %v973_v1 }
 0x328   : > { %v3719_v29 = vpop.eup %2814  ;;  %v975_v30 = vmul.f32 1.442695, %v873_v34  ;;  %v977_v22 = vmul.f32 1.442695, %v874_v35  ;;  %1073 = vadd.xlane.f32.xlu1 %v1072_v28 }
 0x329   : > { %v3721_v31 = vpop.eup %2816  ;;  %v801_v33 = vpop.xlane.xlu1 %800 }
 0x32a   : > { %2826 = vpow2.f32 %v975_v30  ;;  %v875_v32 = vsub.f32 %v3489_v40, %v801_v33  ;;  %v876_v7 = vsub.f32 %v3491_v41, %v801_v33  ;;  %v1075_v37 = vadd.f32 %v3721_v31, %v3719_v29 }
 0x32b   : > { %2828 = vpow2.f32 %v977_v22 }
 0x32c   : > { %v3727_v38 = vpop.eup %2818  ;;  %v979_v16 = vmul.f32 1.442695, %v875_v32  ;;  %v981_v21 = vmul.f32 1.442695, %v876_v7  ;;  %1076 = vadd.xlane.f32.xlu0 %v1075_v37 }
 0x32d   : > { %v3729_v60 = vpop.eup %2820  ;;  %v804_v1 = vpop.xlane.xlu1 %803 }
 0x32e   : > { %2830 = vpow2.f32 %v979_v16  ;;  %v877_v43 = vsub.f32 %v3495_v45, %v804_v1  ;;  %v878_v34 = vsub.f32 %v3497_v48, %v804_v1  ;;  %v1078_v40 = vadd.f32 %v3729_v60, %v3727_v38 }
 0x32f   : > { %2832 = vpow2.f32 %v981_v21 }
 0x330   : > { %v3735_v41 = vpop.eup %2822  ;;  %v983_v35 = vmul.f32 1.442695, %v877_v43  ;;  %v985_v28 = vmul.f32 1.442695, %v878_v34  ;;  %1079 = vadd.xlane.f32.xlu1 %v1078_v40 }
 0x331   : > { %v3737_v30 = vpop.eup %2824  ;;  %v807_v22 = vpop.xlane.xlu1 %806 }
 0x332   : > { %2834 = vpow2.f32 %v983_v35  ;;  %v879_v33 = vsub.f32 %v3501_v54, %v807_v22  ;;  %v880_v32 = vsub.f32 %v3503_v57, %v807_v22  ;;  %v1081_v45 = vadd.f32 %v3737_v30, %v3735_v41 }
 0x333   : > { %2836 = vpow2.f32 %v985_v28 }
 0x334   : > { %v3743_v48 = vpop.eup %2826  ;;  %v987_v7 = vmul.f32 1.442695, %v879_v33  ;;  %v989_v37 = vmul.f32 1.442695, %v880_v32  ;;  %1082 = vadd.xlane.f32.xlu0 %v1081_v45 }
 0x335   : > { %v3745_v16 = vpop.eup %2828  ;;  %v810_v21 = vpop.xlane.xlu1 %809 }
 0x336   : > { %2838 = vpow2.f32 %v987_v7  ;;  %v881_v1 = vsub.f32 %v3507_v63, %v810_v21  ;;  %v882_v43 = vsub.f32 %v3509_v3, %v810_v21  ;;  %v1084_v54 = vadd.f32 %v3745_v16, %v3743_v48  ;;  %v4657_v21 = vld [vmem:[#allocation5_spill] sm:$0xff] }
 0x337   : > { %2840 = vpow2.f32 %v989_v37 }
 0x338   : > { %v3751_v57 = vpop.eup %2830  ;;  %v991_v34 = vmul.f32 1.442695, %v881_v1  ;;  %v993_v40 = vmul.f32 1.442695, %v882_v43  ;;  %1085 = vadd.xlane.f32.xlu1 %v1084_v54  ;;  %v4658_v43 = vld [vmem:[#allocation6_spill] sm:$0xff] }
 0x339   : > { %v3753_v35 = vpop.eup %2832  ;;  %v813_v28 = vpop.xlane.xlu1 %812 }
 0x33a   : > { %2842 = vpow2.f32 %v991_v34  ;;  %v883_v22 = vsub.f32 %v3513_v9, %v813_v28  ;;  %v884_v33 = vsub.f32 %v3515_v12, %v813_v28  ;;  %v1087_v63 = vadd.f32 %v3753_v35, %v3751_v57 }
 0x33b   : > { %2844 = vpow2.f32 %v993_v40 }
 0x33c   : > { %v3759_v3 = vpop.eup %2834  ;;  %v995_v32 = vmul.f32 1.442695, %v883_v22  ;;  %v997_v45 = vmul.f32 1.442695, %v884_v33  ;;  %1088 = vadd.xlane.f32.xlu0 %v1087_v63  ;;  %v4661_v33 = vld [vmem:[#allocation7_spill] sm:$0xff] }
 0x33d   : > { %4656 = vst [vmem:[#allocation18_spill] sm:$0xff] %v3759_v3  ;;  %v3761_v7 = vpop.eup %2836  ;;  %v816_v37 = vpop.xlane.xlu1 %815 }
 0x33e   : > { %2846 = vpow2.f32 %v995_v32  ;;  %v885_v1 = vsub.f32 %v4657_v21, %v816_v37  ;;  %v886_v54 = vsub.f32 %v4658_v43, %v816_v37  ;;  %v1090_v9 = vadd.f32 %v3761_v7, %v3759_v3  ;;  %v4662_v32 = vld [vmem:[#allocation8_spill] sm:$0xff] }
 0x33f   : > { %2848 = vpow2.f32 %v997_v45 }
 0x340   : > { %v3767_v12 = vpop.eup %2838  ;;  %v999_v34 = vmul.f32 1.442695, %v885_v1  ;;  %v1001_v40 = vmul.f32 1.442695, %v886_v54  ;;  %1091 = vadd.xlane.f32.xlu1 %v1090_v9  ;;  %v4665_v9 = vld [vmem:[#allocation9_spill] sm:$0xff] }
 0x341   : > { %4659 = vst [vmem:[#allocation5_spill] sm:$0xff] %v3767_v12  ;;  %v3769_v28 = vpop.eup %2840  ;;  %v819_v22 = vpop.xlane.xlu1 %818 }
 0x342   : > { %4660 = vst [vmem:[#allocation6_spill] sm:$0xff] %v3769_v28  ;;  %2850 = vpow2.f32 %v999_v34  ;;  %v887_v63 = vsub.f32 %v4661_v33, %v819_v22  ;;  %v888_v4 = vsub.f32 %v4662_v32, %v819_v22  ;;  %v1093_v37 = vadd.f32 %v3769_v28, %v3767_v12  ;;  %v4666_v34 = vld [vmem:[#allocation10_spill] sm:$0xff] }
 0x343   : > { %2852 = vpow2.f32 %v1001_v40 }
 0x344   : > { %v3775_v21 = vpop.eup %2842  ;;  %v1003_v45 = vmul.f32 1.442695, %v887_v63  ;;  %v1005_v43 = vmul.f32 1.442695, %v888_v4  ;;  %1094 = vadd.xlane.f32.xlu0 %v1093_v37  ;;  %v4669_v37 = vld [vmem:[#allocation11_spill] sm:$0xff] }
 0x345   : > { %4663 = vst [vmem:[#allocation7_spill] sm:$0xff] %v3775_v21  ;;  %v3777_v1 = vpop.eup %2844  ;;  %v822_v54 = vpop.xlane.xlu1 %821 }
 0x346   : > { %4664 = vst [vmem:[#allocation8_spill] sm:$0xff] %v3777_v1  ;;  %2854 = vpow2.f32 %v1003_v45  ;;  %v889_v20 = vsub.f32 %v4665_v9, %v822_v54  ;;  %v890_v3 = vsub.f32 %v4666_v34, %v822_v54  ;;  %v1096_v22 = vadd.f32 %v3777_v1, %v3775_v21  ;;  %v4670_v45 = vld [vmem:[#allocation12_spill] sm:$0xff] }
 0x347   : > { %2856 = vpow2.f32 %v1005_v43 }
 0x348   : > { %v3783_v33 = vpop.eup %2846  ;;  %v1007_v40 = vmul.f32 1.442695, %v889_v20  ;;  %v1009_v32 = vmul.f32 1.442695, %v890_v3  ;;  %1097 = vadd.xlane.f32.xlu1 %v1096_v22  ;;  %v4672_v22 = vld [vmem:[#allocation13_spill] sm:$0xff] }
 0x349   : > { %4667 = vst [vmem:[#allocation9_spill] sm:$0xff] %v3783_v33  ;;  %v3785_v63 = vpop.eup %2848  ;;  %v825_v4 = vpop.xlane.xlu1 %824 }
 0x34a   : > { %4668 = vst [vmem:[#allocation10_spill] sm:$0xff] %v3785_v63  ;;  %2858 = vpow2.f32 %v1007_v40  ;;  %v891_v12 = vsub.f32 %v4669_v37, %v825_v4  ;;  %v892_v28 = vsub.f32 %v4670_v45, %v825_v4  ;;  %v1099_v54 = vadd.f32 %v3785_v63, %v3783_v33  ;;  %v4673_v40 = vld [vmem:[#allocation14_spill] sm:$0xff] }
 0x34b   : > { %2860 = vpow2.f32 %v1009_v32 }
 0x34c   : > { %v3791_v9 = vpop.eup %2850  ;;  %v1011_v43 = vmul.f32 1.442695, %v891_v12  ;;  %v1013_v34 = vmul.f32 1.442695, %v892_v28  ;;  %1100 = vadd.xlane.f32.xlu0 %v1099_v54  ;;  %v4674_v54 = vld [vmem:[#allocation15_spill] sm:$0xff] }
 0x34d   : > { %4671 = vst [vmem:[#allocation11_spill] sm:$0xff] %v3791_v9  ;;  %v3793_v20 = vpop.eup %2852  ;;  %v828_v3 = vpop.xlane.xlu1 %827 }
 0x34e   : > { %2862 = vpow2.f32 %v1011_v43  ;;  %v893_v21 = vsub.f32 %v4672_v22, %v828_v3  ;;  %v894_v1 = vsub.f32 %v4673_v40, %v828_v3  ;;  %v1102_v4 = vadd.f32 %v3793_v20, %v3791_v9  ;;  %v4675_v43 = vld [vmem:[#allocation16_spill] sm:$0xff] }
 0x34f   : > { %2864 = vpow2.f32 %v1013_v34 }
 0x350   : > { %v3799_v37 = vpop.eup %2854  ;;  %v1015_v32 = vmul.f32 1.442695, %v893_v21  ;;  %v1017_v45 = vmul.f32 1.442695, %v894_v1  ;;  %1103 = vadd.xlane.f32.xlu1 %v1102_v4 }
 0x351   : > { %v3801_v12 = vpop.eup %2856  ;;  %v831_v28 = vpop.xlane.xlu1 %830 }
 0x352   : > { %2866 = vpow2.f32 %v1015_v32  ;;  %v895_v33 = vsub.f32 %v4674_v54, %v831_v28  ;;  %v896_v63 = vsub.f32 %v4675_v43, %v831_v28  ;;  %v1105_v3 = vadd.f32 %v3801_v12, %v3799_v37  ;;  %v4677_v32 = vld [vmem:[#allocation17_spill] sm:$0xff] }
 0x353   : > { %2868 = vpow2.f32 %v1017_v45 }
 0x354   : > { %v3807_v22 = vpop.eup %2858  ;;  %v1019_v34 = vmul.f32 1.442695, %v895_v33  ;;  %v1021_v40 = vmul.f32 1.442695, %v896_v63  ;;  %1106 = vadd.xlane.f32.xlu0 %v1105_v3 }
 0x355   : > { %4676 = vst [vmem:[#allocation12_spill] sm:$0xff] %v3807_v22  ;;  %v3809_v21 = vpop.eup %2860  ;;  %v834_v1 = vpop.xlane.xlu1 %833 }
 0x356   : > { %2870 = vpow2.f32 %v1019_v34  ;;  %v897_v4 = vsub.f32 %v3565_v42, %v834_v1  ;;  %v898_v9 = vsub.f32 %v4677_v32, %v834_v1  ;;  %v1108_v28 = vadd.f32 %v3809_v21, %v3807_v22 }
 0x357   : > { %2872 = vpow2.f32 %v1021_v40  ;;  %v4689_v22 = vmax.f32 %v3659_v17, 0.0 }
 0x358   : > { %v3815_v54 = vpop.eup %2862  ;;  %v1023_v45 = vmul.f32 1.442695, %v897_v4  ;;  %v1025_v43 = vmul.f32 1.442695, %v898_v9  ;;  %1109 = vadd.xlane.f32.xlu1 %v1108_v28 }
 0x359   : > { %4678 = vst [vmem:[#allocation13_spill] sm:$0xff] %v3815_v54  ;;  %v3817_v33 = vpop.eup %2864 }
 0x35a   : > { %4679 = vst [vmem:[#allocation14_spill] sm:$0xff] %v3817_v33  ;;  %2874 = vpow2.f32 %v1023_v45  ;;  %v1111_v63 = vadd.f32 %v3817_v33, %v3815_v54 }
 0x35b   : > { %2876 = vpow2.f32 %v1025_v43 }
 0x35c   : > { %v3821_v3 = vpop.eup %2866  ;;  %1112 = vadd.xlane.f32.xlu0 %v1111_v63 }
 0x35d   : > { %4680 = vst [vmem:[#allocation15_spill] sm:$0xff] %v3821_v3  ;;  %v3823_v42 = vpop.eup %2868 }
 0x35e   : > { %4681 = vst [vmem:[#allocation16_spill] sm:$0xff] %v3823_v42  ;;  %v1114_v34 = vadd.f32 %v3823_v42, %v3821_v3 }
 0x360   : > { %v3827_v40 = vpop.eup %2870  ;;  %1115 = vadd.xlane.f32.xlu1 %v1114_v34  ;;  %v3839_v34 = vpop.f32.mrb[4].mxu1 }
 0x361   : > { %4682 = vst [vmem:[#allocation17_spill] sm:$0xff] %v3827_v40  ;;  %v3829_v9 = vpop.eup %2872  ;;  %4686 = vst [vmem:[#allocation22_spill] sm:$0xff] %v3839_v34  ;;  %v3841_v3 = vpop.f32.mrb[5].mxu1 }
 0x362   : > { %4683 = vst [vmem:[#allocation19_spill] sm:$0xff] %v3829_v9  ;;  %v1117_v1 = vadd.f32 %v3829_v9, %v3827_v40  ;;  %4687 = vst [vmem:[#allocation23_spill] sm:$0xff] %v3841_v3 }
 0x364   : > { %v3833_v4 = vpop.eup %2874  ;;  %1118 = vadd.xlane.f32.xlu0 %v1117_v1 }
 0x365   : > { %4684 = vst [vmem:[#allocation20_spill] sm:$0xff] %v3833_v4  ;;  %v3835_v32 = vpop.eup %2876 }
 0x366   : > { %4685 = vst [vmem:[#allocation21_spill] sm:$0xff] %v3835_v32  ;;  %v1120_v28 = vadd.f32 %v3835_v32, %v3833_v4 }
 0x368   : > { %1121 = vadd.xlane.f32.xlu1 %v1120_v28 }
 0x36c   : > { %v3843_v1 = vpop.f32.mrb[6].mxu1 }
 0x36d   : > { %4688 = vst [vmem:[#allocation24_spill] sm:$0xff] %v3843_v1  ;;  %v301_v4 = vpop.f32.mrb[7].mxu1 }
 0x36e   : > { %v311_v34 = vmax.f32 %v301_v4, 0.0 }
 0x370   : > { %1283 = vmatprep.mubr.f32.mxu0 %v311_v34 }
 0x379   : > { %v1029_v45 = vpop.xlane.xlu1 %1028 }
 0x37a   : > { %2878 = vrcp.f32 %v1029_v45 }
 0x37d   : > { %v1032_v43 = vpop.xlane.xlu1 %1031 }
 0x37e   : > { %2880 = vrcp.f32 %v1032_v43 }
 0x381   : > { %v1035_v63 = vpop.xlane.xlu1 %1034 }
 0x382   : > { %2882 = vrcp.f32 %v1035_v63 }
 0x384   : > { %v2879_v40 = vpop.eup %2878 }
 0x385   : > { %v1038_v9 = vpop.xlane.xlu1 %1037  ;;  %v1156_v42 = vmul.f32 %v2879_v40, %v3581_v51  ;;  %v1155_v43 = vmul.f32 %v2879_v40, %v3579_v47 }
 0x386   : > { %2884 = vrcp.f32 %v1038_v9 }
 0x388   : > { %v2881_v54 = vpop.eup %2880 }
 0x389   : > { %v1041_v28 = vpop.xlane.xlu1 %1040  ;;  %v1158_v45 = vmul.f32 %v2881_v54, %v3589_v15  ;;  %v1157_v32 = vmul.f32 %v2881_v54, %v3587_v52 }
 0x38a   : > { %2886 = vrcp.f32 %v1041_v28 }
 0x38b   : > { %v2646_v63 = vpack.c.bf16 %v1158_v45, %v1156_v42  ;;  %v2648_v33 = vpack.c.bf16 %v1157_v32, %v1155_v43 }
 0x38c   : > { %v2883_v3 = vpop.eup %2882 }
 0x38d   : > { %2647 = vmatprep.subr.bf16.mxu0 %v2646_v63  ;;  %v1044_v9 = vpop.xlane.xlu1 %1043  ;;  %v1160_v15 = vmul.f32 %v2883_v3, %v3597_v44  ;;  %v1159_v52 = vmul.f32 %v2883_v3, %v3595_v56  ;;  %v4690_v3 = vmax.f32 %v3694_v46, 0.0 }
 0x38e   : > { %2888 = vrcp.f32 %v1044_v9  ;;  %2649 = vmatpush1.bf16.xpose.msra.mxu0 %v2648_v33 }
 0x390   : > { %v2885_v1 = vpop.eup %2884 }
 0x391   : > { %v1047_v51 = vpop.xlane.xlu1 %1046  ;;  %1290 = vxpose.xlu0.b32.start.end [1/1] (short) %v4689_v22, 128  ;;  %v1162_v47 = vmul.f32 %v2885_v1, %v3605_v0  ;;  %v1161_v54 = vmul.f32 %v2885_v1, %v3603_v59 }
 0x392   : > { %2890 = vrcp.f32 %v1047_v51 }
 0x393   : > { %v2650_v42 = vpack.c.bf16 %v1162_v47, %v1160_v15  ;;  %v2652_v40 = vpack.c.bf16 %v1161_v54, %v1159_v52 }
 0x394   : > { %v2887_v32 = vpop.eup %2886 }
 0x395   : > { %2651 = vmatprep.subr.bf16.mxu0 %v2650_v42  ;;  %v1050_v4 = vpop.xlane.xlu1 %1049  ;;  %v1164_v17 = vmul.f32 %v2887_v32, %v3613_v36  ;;  %v1163_v0 = vmul.f32 %v2887_v32, %v3611_v62 }
 0x396   : > { %2892 = vrcp.f32 %v1050_v4  ;;  %2653 = vmatpush1.bf16.xpose.msra.mxu0 %v2652_v40 }
 0x398   : > { %v2889_v33 = vpop.eup %2888 }
 0x399   : > { %v1053_v34 = vpop.xlane.xlu1 %1052  ;;  %v1166_v44 = vmul.f32 %v2889_v33, %v3621_v6  ;;  %v1165_v56 = vmul.f32 %v2889_v33, %v3619_v2 }
 0x39a   : > { %2894 = vrcp.f32 %v1053_v34 }
 0x39b   : > { %v2654_v22 = vpack.c.bf16 %v1166_v44, %v1164_v17  ;;  %v2656_v59 = vpack.c.bf16 %v1165_v56, %v1163_v0  ;;  %1322 = vxpose.xlu1.b32.start.end [1/1] (short) %v4690_v3, 128 }
 0x39c   : > { %v2891_v28 = vpop.eup %2890 }
 0x39d   : > { %2655 = vmatprep.subr.bf16.mxu0 %v2654_v22  ;;  %v1056_v1 = vpop.xlane.xlu1 %1055  ;;  %v1168_v36 = vmul.f32 %v2891_v28, %v3629_v49  ;;  %v1167_v62 = vmul.f32 %v2891_v28, %v3627_v5 }
 0x39e   : > { %2896 = vrcp.f32 %v1056_v1  ;;  %2657 = vmatpush1.bf16.xpose.msra.mxu0 %v2656_v59 }
 0x3a0   : > { %v2893_v45 = vpop.eup %2892 }
 0x3a1   : > { %v1059_v43 = vpop.xlane.xlu1 %1058  ;;  %v1170_v6 = vmul.f32 %v2893_v45, %v3637_v39  ;;  %v1169_v2 = vmul.f32 %v2893_v45, %v3635_v8 }
 0x3a2   : > { %2898 = vrcp.f32 %v1059_v43 }
 0x3a3   : > { %v2658_v63 = vpack.c.bf16 %v1170_v6, %v1168_v36  ;;  %v2660_v9 = vpack.c.bf16 %v1169_v2, %v1167_v62 }
 0x3a4   : > { %v2895_v51 = vpop.eup %2894 }
 0x3a5   : > { %2659 = vmatprep.subr.bf16.mxu0 %v2658_v63  ;;  %v1062_v46 = vpop.xlane.xlu1 %1061  ;;  %v1172_v52 = vmul.f32 %v2895_v51, %v3645_v27  ;;  %v1171_v39 = vmul.f32 %v2895_v51, %v3643_v11 }
 0x3a6   : > { %2900 = vrcp.f32 %v1062_v46  ;;  %2661 = vmatpush1.bf16.xpose.msra.mxu0 %v2660_v9 }
 0x3a8   : > { %v2897_v15 = vpop.eup %2896 }
 0x3a9   : > { %v1065_v47 = vpop.xlane.xlu0 %1064  ;;  %v1174_v49 = vmul.f32 %v2897_v15, %v3653_v50  ;;  %v1173_v5 = vmul.f32 %v2897_v15, %v3651_v14 }
 0x3aa   : > { %2902 = vrcp.f32 %v1065_v47 }
 0x3ab   : > { %v2662_v54 = vpack.c.bf16 %v1174_v49, %v1172_v52  ;;  %v2664_v8 = vpack.c.bf16 %v1173_v5, %v1171_v39 }
 0x3ac   : > { %v2899_v40 = vpop.eup %2898 }
 0x3ad   : > { %2663 = vmatprep.subr.bf16.mxu0 %v2662_v54  ;;  %v1068_v42 = vpop.xlane.xlu1 %1067  ;;  %v1176_v33 = vmul.f32 %v2899_v40, %v3663_v55  ;;  %v1175_v50 = vmul.f32 %v2899_v40, %v3661_v53 }
 0x3ae   : > { %2904 = vrcp.f32 %v1068_v42  ;;  %2665 = vmatpush1.bf16.xpose.msra.mxu0 %v2664_v8 }
 0x3b0   : > { %v2901_v4 = vpop.eup %2900 }
 0x3b1   : > { %v1071_v32 = vpop.xlane.xlu0 %1070  ;;  %v1178_v27 = vmul.f32 %v2901_v4, %v3671_v58  ;;  %v1177_v11 = vmul.f32 %v2901_v4, %v3669_v24  ;;  %v4691_v4 = vld [vmem:[#allocation18_spill] sm:$0xff] }
 0x3b2   : > { %2906 = vrcp.f32 %v1071_v32 }
 0x3b3   : > { %v2666_v34 = vpack.c.bf16 %v1178_v27, %v1176_v33  ;;  %v2668_v14 = vpack.c.bf16 %v1177_v11, %v1175_v50 }
 0x3b4   : > { %v2903_v44 = vpop.eup %2902 }
 0x3b5   : > { %2667 = vmatprep.subr.bf16.mxu0 %v2666_v34  ;;  %v1074_v17 = vpop.xlane.xlu1 %1073  ;;  %v1180_v22 = vmul.f32 %v2903_v44, %v3679_v61  ;;  %v1179_v58 = vmul.f32 %v2903_v44, %v3677_v23  ;;  %v4692_v34 = vld [vmem:[#allocation6_spill] sm:$0xff]  ;;  %v4694_v44 = vld [vmem:[#allocation5_spill] sm:$0xff] }
 0x3b6   : > { %2908 = vrcp.f32 %v1074_v17  ;;  %2669 = vmatpush1.bf16.xpose.msra.mxu0 %v2668_v14  ;;  %v4693_v17 = vld [vmem:[#allocation8_spill] sm:$0xff] }
 0x3b8   : > { %v2905_v0 = vpop.eup %2904 }
 0x3b9   : > { %v1077_v56 = vpop.xlane.xlu0 %1076  ;;  %v1182_v55 = vmul.f32 %v2905_v0, %v3687_v10  ;;  %v1181_v53 = vmul.f32 %v2905_v0, %v3685_v26  ;;  %v4695_v0 = vld [vmem:[#allocation7_spill] sm:$0xff] }
 0x3ba   : > { %2910 = vrcp.f32 %v1077_v56 }
 0x3bb   : > { %v2670_v59 = vpack.c.bf16 %v1182_v55, %v1180_v22  ;;  %v2672_v24 = vpack.c.bf16 %v1181_v53, %v1179_v58 }
 0x3bc   : > { %v2907_v1 = vpop.eup %2906 }
 0x3bd   : > { %2671 = vmatprep.subr.bf16.mxu0 %v2670_v59  ;;  %v1080_v3 = vpop.xlane.xlu1 %1079  ;;  %v1184_v43 = vmul.f32 %v2907_v1, %v3701_v18  ;;  %v1183_v10 = vmul.f32 %v2907_v1, %v3697_v13 }
 0x3be   : > { %2912 = vrcp.f32 %v1080_v3  ;;  %2673 = vmatpush1.bf16.xpose.msra.mxu0 %v2672_v24  ;;  %v4696_v24 = vld [vmem:[#allocation10_spill] sm:$0xff] }
 0x3c0   : > { %v2909_v28 = vpop.eup %2908 }
 0x3c1   : > { %v1083_v45 = vpop.xlane.xlu0 %1082  ;;  %v1186_v61 = vmul.f32 %v2909_v28, %v3713_v19  ;;  %v1185_v23 = vmul.f32 %v2909_v28, %v3710_v25  ;;  %v4697_v28 = vld [vmem:[#allocation9_spill] sm:$0xff] }
 0x3c2   : > { %2914 = vrcp.f32 %v1083_v45 }
 0x3c3   : > { %v2674_v36 = vpack.c.bf16 %v1186_v61, %v1184_v43  ;;  %v2676_v26 = vpack.c.bf16 %v1185_v23, %v1183_v10  ;;  %v4698_v43 = vld [vmem:[#allocation11_spill] sm:$0xff] }
 0x3c4   : > { %v2911_v62 = vpop.eup %2910 }
 0x3c5   : > { %2675 = vmatprep.subr.bf16.mxu0 %v2674_v36  ;;  %v1086_v6 = vpop.xlane.xlu1 %1085  ;;  %v1188_v9 = vmul.f32 %v2911_v62, %v3721_v31  ;;  %v1187_v19 = vmul.f32 %v2911_v62, %v3719_v29 }
 0x3c6   : > { %2916 = vrcp.f32 %v1086_v6  ;;  %2677 = vmatpush1.bf16.xpose.msra.mxu0 %v2676_v26 }
 0x3c8   : > { %v2913_v2 = vpop.eup %2912 }
 0x3c9   : > { %v1089_v63 = vpop.xlane.xlu0 %1088  ;;  %v1190_v18 = vmul.f32 %v2913_v2, %v3729_v60  ;;  %v1189_v13 = vmul.f32 %v2913_v2, %v3727_v38 }
 0x3ca   : > { %2918 = vrcp.f32 %v1089_v63 }
 0x3cb   : > { %v2678_v46 = vpack.c.bf16 %v1190_v18, %v1188_v9  ;;  %v2680_v25 = vpack.c.bf16 %v1189_v13, %v1187_v19  ;;  %v4699_v9 = vld [vmem:[#allocation12_spill] sm:$0xff] }
 0x3cc   : > { %v2915_v15 = vpop.eup %2914 }
 0x3cd   : > { %2679 = vmatprep.subr.bf16.mxu0 %v2678_v46  ;;  %v1092_v51 = vpop.xlane.xlu1 %1091  ;;  %v1192_v49 = vmul.f32 %v2915_v15, %v3737_v30  ;;  %v1191_v60 = vmul.f32 %v2915_v15, %v3735_v41  ;;  %v4700_v15 = vld [vmem:[#allocation14_spill] sm:$0xff] }
 0x3ce   : > { %2920 = vrcp.f32 %v1092_v51  ;;  %2681 = vmatpush1.bf16.xpose.msra.mxu0 %v2680_v25 }
 0x3d0   : > { %v2917_v47 = vpop.eup %2916 }
 0x3d1   : > { %v1095_v52 = vpop.xlane.xlu0 %1094  ;;  %v1194_v31 = vmul.f32 %v2917_v47, %v3745_v16  ;;  %v1193_v29 = vmul.f32 %v2917_v47, %v3743_v48 }
 0x3d2   : > { %2922 = vrcp.f32 %v1095_v52  ;;  %v4701_v52 = vld [vmem:[#allocation16_spill] sm:$0xff] }
 0x3d3   : > { %v2682_v39 = vpack.c.bf16 %v1194_v31, %v1192_v49  ;;  %v2684_v38 = vpack.c.bf16 %v1193_v29, %v1191_v60 }
 0x3d4   : > { %v2919_v54 = vpop.eup %2918 }
 0x3d5   : > { %2683 = vmatprep.subr.bf16.mxu0 %v2682_v39  ;;  %v1098_v5 = vpop.xlane.xlu1 %1097  ;;  %v1196_v40 = vmul.f32 %v2919_v54, %v3753_v35  ;;  %v1195_v16 = vmul.f32 %v2919_v54, %v3751_v57 }
 0x3d6   : > { %2924 = vrcp.f32 %v1098_v5  ;;  %2685 = vmatpush1.bf16.xpose.msra.mxu0 %v2684_v38  ;;  %v4704_v38 = vld [vmem:[#allocation23_spill] sm:$0xff] }
 0x3d7   : > { %v309_v5 = vmax.f32 %v4704_v38, 0.0 }
 0x3d8   : > { %v2921_v8 = vpop.eup %2920 }
 0x3d9   : > { %v1101_v42 = vpop.xlane.xlu0 %1100  ;;  %v1198_v30 = vmul.f32 %v2921_v8, %v3761_v7  ;;  %v1197_v41 = vmul.f32 %v2921_v8, %v4691_v4  ;;  %v4705_v8 = vld [vmem:[#allocation19_spill] sm:$0xff] }
 0x3da   : > { %2926 = vrcp.f32 %v1101_v42 }
 0x3db   : > { %v2686_v32 = vpack.c.bf16 %v1198_v30, %v1196_v40  ;;  %v2688_v48 = vpack.c.bf16 %v1197_v41, %v1195_v16  ;;  %v4706_v40 = vld [vmem:[#allocation21_spill] sm:$0xff]  ;;  %v4708_v41 = vld [vmem:[#allocation20_spill] sm:$0xff] }
 0x3dc   : > { %v2923_v27 = vpop.eup %2922  ;;  %v4707_v16 = vld [vmem:[#allocation17_spill] sm:$0xff] }
 0x3dd   : > { %2687 = vmatprep.subr.bf16.mxu0 %v2686_v32  ;;  %v1104_v33 = vpop.xlane.xlu1 %1103  ;;  %v1200_v14 = vmul.f32 %v2923_v27, %v4692_v34  ;;  %v1199_v7 = vmul.f32 %v2923_v27, %v4694_v44  ;;  %v4710_v34 = vld [vmem:[#allocation24_spill] sm:$0xff]  ;;  %v4711_v44 = vmov 0.0  }
 0x3de   : > { %2928 = vrcp.f32 %v1104_v33  ;;  %2689 = vmatpush1.bf16.xpose.msra.mxu0 %v2688_v48  ;;  %v2284_v48 = vrot.slane %v309_v5, 4 }
 0x3e0   : > { %v2925_v50 = vpop.eup %2924 }
 0x3e1   : > { %v1107_v11 = vpop.xlane.xlu0 %1106  ;;  %v1202_v35 = vmul.f32 %v2925_v50, %v4693_v17  ;;  %v1201_v57 = vmul.f32 %v2925_v50, %v4695_v0  ;;  %v4709_v50 = vld [vmem:[#allocation22_spill] sm:$0xff] }
 0x3e2   : > { %2930 = vrcp.f32 %v1107_v11  ;;  %v308_v11 = vmax.f32 %v4709_v50, 0.0 }
 0x3e3   : > { %v2690_v56 = vpack.c.bf16 %v1202_v35, %v1200_v14  ;;  %v2692_v22 = vpack.c.bf16 %v1201_v57, %v1199_v7  ;;  %v310_v14 = vmax.f32 %v4710_v34, 0.0 }
 0x3e4   : > { %v2927_v58 = vpop.eup %2926  ;;  %v2283_v17 = vrot.slane %v308_v11, 4 }
 0x3e5   : > { %2691 = vmatprep.subr.bf16.mxu0 %v2690_v56  ;;  %v1110_v55 = vpop.xlane.xlu1 %1109  ;;  %v1204_v3 = vmul.f32 %v2927_v58, %v4696_v24  ;;  %v1203_v45 = vmul.f32 %v2927_v58, %v4697_v28 }
 0x3e6   : > { %2932 = vrcp.f32 %v1110_v55  ;;  %2693 = vmatpush1.bf16.xpose.msra.mxu0 %v2692_v22 }
 0x3e8   : > { %v2929_v53 = vpop.eup %2928 }
 0x3e9   : > { %v1113_v59 = vpop.xlane.xlu0 %1112  ;;  %v1206_v1 = vmul.f32 %v2929_v53, %v3793_v20  ;;  %v1205_v61 = vmul.f32 %v2929_v53, %v4698_v43 }
 0x3ea   : > { %2934 = vrcp.f32 %v1113_v59 }
 0x3eb   : > { %v2694_v10 = vpack.c.bf16 %v1206_v1, %v1204_v3  ;;  %v2696_v23 = vpack.c.bf16 %v1205_v61, %v1203_v45 }
 0x3ec   : > { %v2931_v26 = vpop.eup %2930 }
 0x3ed   : > { %2695 = vmatprep.subr.bf16.mxu0 %v2694_v10  ;;  %v1116_v36 = vpop.xlane.xlu1 %1115  ;;  %v1208_v2 = vmul.f32 %v2931_v26, %v3801_v12  ;;  %v1207_v20 = vmul.f32 %v2931_v26, %v3799_v37  ;;  %v4702_v12 = vld [vmem:[#allocation13_spill] sm:$0xff] }
 0x3ee   : > { %2936 = vrcp.f32 %v1116_v36  ;;  %2697 = vmatpush1.bf16.xpose.msra.mxu0 %v2696_v23 }
 0x3f0   : > { %v2933_v6 = vpop.eup %2932 }
 0x3f1   : > { %v1119_v62 = vpop.xlane.xlu0 %1118  ;;  %v1210_v63 = vmul.f32 %v2933_v6, %v3809_v21  ;;  %v1209_v18 = vmul.f32 %v2933_v6, %v4699_v9  ;;  %v4703_v21 = vld [vmem:[#allocation15_spill] sm:$0xff] }
 0x3f2   : > { %2938 = vrcp.f32 %v1119_v62 }
 0x3f3   : > { %v2698_v19 = vpack.c.bf16 %v1210_v63, %v1208_v2  ;;  %v2700_v13 = vpack.c.bf16 %v1209_v18, %v1207_v20 }
 0x3f4   : > { %v2935_v25 = vpop.eup %2934 }
 0x3f5   : > { %2699 = vmatprep.subr.bf16.mxu0 %v2698_v19  ;;  %v1122_v46 = vpop.xlane.xlu1 %1121  ;;  %v1212_v47 = vmul.f32 %v2935_v25, %v4700_v15  ;;  %v1211_v31 = vmul.f32 %v2935_v25, %v4702_v12 }
 0x3f6   : > { %2940 = vrcp.f32 %v1122_v46  ;;  %2701 = vmatpush1.bf16.xpose.msra.mxu0 %v2700_v13 }
 0x3f8   : > { %v2937_v51 = vpop.eup %2936 }
 0x3f9   : > { %v1214_v49 = vmul.f32 %v2937_v51, %v4701_v52  ;;  %v1213_v60 = vmul.f32 %v2937_v51, %v4703_v21 }
 0x3fb   : > { %v2702_v37 = vpack.c.bf16 %v1214_v49, %v1212_v47  ;;  %v2704_v29 = vpack.c.bf16 %v1213_v60, %v1211_v31 }
 0x3fc   : > { %v2939_v39 = vpop.eup %2938 }
 0x3fd   : > { %2703 = vmatprep.subr.bf16.mxu0 %v2702_v37  ;;  %v1216_v42 = vmul.f32 %v2939_v39, %v4705_v8  ;;  %v1215_v4 = vmul.f32 %v2939_v39, %v4707_v16 }
 0x3fe   : > { %2705 = vmatpush1.bf16.xpose.msra.mxu0 %v2704_v29 }
 0x400   : > { %v2941_v54 = vpop.eup %2940 }
 0x401   : > { %v1218_v30 = vmul.f32 %v2941_v54, %v4706_v40  ;;  %v1217_v32 = vmul.f32 %v2941_v54, %v4708_v41 }
 0x403   : > { %v2706_v33 = vpack.c.bf16 %v1218_v30, %v1216_v42  ;;  %v2708_v27 = vpack.c.bf16 %v1217_v32, %v1215_v4 }
 0x405   : > { %2707 = vmatprep.subr.bf16.mxu0 %v2706_v33 }
 0x406   : > { %2709 = vmatpush1.bf16.xpose.msra.mxu0 %v2708_v27 }
 0x407   : > { %2287 = vmatprep.subr.mxu0 %v2284_v48 }
 0x40d   : > { %1284 = vmatmul.mubr.f32.vlgmr.msra.gmra.mrb[64].mxu0 %v310_v14 }
 0x40e   : > { %2288 = vmatpush1.xpose.msra.mxu0 %v2283_v17  ;;  %2351 = vmatprep.mubr.f32.mxu0 %v309_v5 }
 0x411   : > { %v1306_v35 = vpop.trf.xlu0  ;;  %2352 = vmatmul.mubr.f32.vlgmr.msra.gmra.mrb[66].mxu0 %v308_v11 }
 0x412   : > { %2604 = vmatmul.mubr.msk.f32.vlgmr.msra.gmra.mrb[8].mxu1 %vm380_vm2, %v1306_v35  ;;  %2468 = vmatprep.mubr.f32.mxu0 %v4711_v44 }
 0x413   : > { %1528 = vmatprep.mubr.f32.mxu1 %v4711_v44 }
 0x415   : > { %v1307_v7 = vpop.trf.xlu0 }
 0x416   : > { %2605 = vmatmul.mubr.msk.f32.gmra.mrb[10].mxu1 %vm380_vm2, %v1307_v7 }
 0x417   : > { %1534 = vmatprep.mubr.f32.mxu1 %v4711_v44 }
 0x419   : > { %v1308_v0 = vpop.trf.xlu0 }
 0x41a   : > { %2606 = vmatmul.mubr.msk.f32.gmra.mrb[12].mxu1 %vm380_vm2, %v1308_v0 }
 0x41b   : > { %1540 = vmatprep.mubr.f32.mxu1 %v4711_v44  ;;  %v1338_v59 = vpop.trf.xlu1 }
 0x41d   : > { %v1309_v57 = vpop.trf.xlu0 }
 0x41e   : > { %2607 = vmatmul.mubr.msk.f32.gmra.mrb[14].mxu1 %vm380_vm2, %v1309_v57 }
 0x41f   : > { %1546 = vmatprep.mubr.f32.mxu1 %v4711_v44  ;;  %v1339_v3 = vpop.trf.xlu1 }
 0x421   : > { %v1310_v56 = vpop.trf.xlu0 }
 0x422   : > { %2608 = vmatmul.mubr.msk.f32.gmra.mrb[16].mxu1 %vm380_vm2, %v1310_v56 }
 0x423   : > { %1552 = vmatprep.mubr.f32.mxu1 %v4711_v44  ;;  %v1340_v45 = vpop.trf.xlu1 }
 0x425   : > { %v1311_v22 = vpop.trf.xlu0 }
 0x426   : > { %2609 = vmatmul.mubr.msk.f32.gmra.mrb[18].mxu1 %vm380_vm2, %v1311_v22 }
 0x427   : > { %1558 = vmatprep.mubr.f32.mxu1 %v4711_v44  ;;  %v1341_v61 = vpop.trf.xlu1 }
 0x429   : > { %v1312_v55 = vpop.trf.xlu0 }
 0x42a   : > { %2610 = vmatmul.mubr.msk.f32.gmra.mrb[20].mxu1 %vm380_vm2, %v1312_v55 }
 0x42b   : > { %1564 = vmatprep.mubr.f32.mxu1 %v4711_v44  ;;  %v1342_v36 = vpop.trf.xlu1 }
 0x42d   : > { %v1313_v58 = vpop.trf.xlu0 }
 0x42e   : > { %2611 = vmatmul.mubr.msk.f32.gmra.mrb[22].mxu1 %vm380_vm2, %v1313_v58 }
 0x42f   : > { %1570 = vmatprep.mubr.f32.mxu1 %v4711_v44  ;;  %v1343_v6 = vpop.trf.xlu1 }
 0x431   : > { %v1314_v53 = vpop.trf.xlu0 }
 0x432   : > { %2612 = vmatmul.mubr.msk.f32.gmra.mrb[24].mxu1 %vm380_vm2, %v1314_v53 }
 0x433   : > { %1576 = vmatprep.mubr.f32.mxu1 %v4711_v44  ;;  %v1344_v62 = vpop.trf.xlu1 }
 0x435   : > { %v1315_v24 = vpop.trf.xlu0 }
 0x436   : > { %2613 = vmatmul.mubr.msk.f32.gmra.mrb[26].mxu1 %vm380_vm2, %v1315_v24 }
 0x437   : > { %1582 = vmatprep.mubr.f32.mxu1 %v4711_v44  ;;  %v1345_v2 = vpop.trf.xlu1 }
 0x439   : > { %v1316_v1 = vpop.trf.xlu0 }
 0x43a   : > { %2614 = vmatmul.mubr.msk.f32.gmra.mrb[28].mxu1 %vm380_vm2, %v1316_v1 }
 0x43b   : > { %1588 = vmatprep.mubr.f32.mxu1 %v4711_v44  ;;  %v1346_v63 = vpop.trf.xlu1 }
 0x43d   : > { %v1317_v28 = vpop.trf.xlu0 }
 0x43e   : > { %2615 = vmatmul.mubr.msk.f32.gmra.mrb[30].mxu1 %vm380_vm2, %v1317_v28 }
 0x43f   : > { %1594 = vmatprep.mubr.f32.mxu1 %v4711_v44  ;;  %v1347_v20 = vpop.trf.xlu1 }
 0x441   : > { %v1318_v43 = vpop.trf.xlu0 }
 0x442   : > { %2616 = vmatmul.mubr.msk.f32.gmra.mrb[32].mxu1 %vm380_vm2, %v1318_v43 }
 0x443   : > { %1600 = vmatprep.mubr.f32.mxu1 %v4711_v44  ;;  %v1348_v9 = vpop.trf.xlu1 }
 0x445   : > { %v1319_v10 = vpop.trf.xlu0 }
 0x446   : > { %2617 = vmatmul.mubr.msk.f32.gmra.mrb[34].mxu1 %vm380_vm2, %v1319_v10 }
 0x447   : > { %1606 = vmatprep.mubr.f32.mxu1 %v4711_v44  ;;  %v1349_v18 = vpop.trf.xlu1 }
 0x449   : > { %v1320_v23 = vpop.trf.xlu0 }
 0x44a   : > { %2618 = vmatmul.mubr.msk.f32.gmra.mrb[36].mxu1 %vm380_vm2, %v1320_v23 }
 0x44b   : > { %1612 = vmatprep.mubr.f32.mxu1 %v4711_v44  ;;  %v1350_v19 = vpop.trf.xlu1 }
 0x44d   : > { %v1321_v26 = vpop.trf.xlu0 }
 0x44e   : > { %2619 = vmatmul.mubr.msk.f32.gmra.mrb[38].mxu1 %vm380_vm2, %v1321_v26 }
 0x44f   : > { %1618 = vmatprep.mubr.f32.mxu1 %v4711_v44  ;;  %v1351_v13 = vpop.trf.xlu1 }
 0x452   : > { %2620 = vmatmul.mubr.msk.f32.gmra.mrb[40].mxu1 %vm380_vm2, %v1338_v59 }
 0x453   : > { %1624 = vmatprep.mubr.f32.mxu1 %v4711_v44  ;;  %v1352_v46 = vpop.trf.xlu1 }
 0x456   : > { %2621 = vmatmul.mubr.msk.f32.gmra.mrb[42].mxu1 %vm380_vm2, %v1339_v3 }
 0x457   : > { %1630 = vmatprep.mubr.f32.mxu1 %v4711_v44  ;;  %v1353_v25 = vpop.trf.xlu1 }
 0x45a   : > { %2622 = vmatmul.mubr.msk.f32.gmra.mrb[44].mxu1 %vm380_vm2, %v1340_v45 }
 0x45b   : > { %1636 = vmatprep.mubr.f32.mxu1 %v4711_v44 }
 0x45e   : > { %2623 = vmatmul.mubr.msk.f32.gmra.mrb[46].mxu1 %vm380_vm2, %v1341_v61 }
 0x45f   : > { %1642 = vmatprep.mubr.f32.mxu1 %v4711_v44 }
 0x462   : > { %2624 = vmatmul.mubr.msk.f32.gmra.mrb[48].mxu1 %vm380_vm2, %v1342_v36 }
 0x463   : > { %1648 = vmatprep.mubr.f32.mxu1 %v4711_v44 }
 0x466   : > { %2625 = vmatmul.mubr.msk.f32.gmra.mrb[50].mxu1 %vm380_vm2, %v1343_v6 }
 0x467   : > { %1654 = vmatprep.mubr.f32.mxu1 %v4711_v44 }
 0x46a   : > { %2626 = vmatmul.mubr.msk.f32.gmra.mrb[52].mxu1 %vm380_vm2, %v1344_v62 }
 0x46b   : > { %1660 = vmatprep.mubr.f32.mxu1 %v4711_v44 }
 0x46e   : > { %2627 = vmatmul.mubr.msk.f32.gmra.mrb[54].mxu1 %vm380_vm2, %v1345_v2 }
 0x46f   : > { %1666 = vmatprep.mubr.f32.mxu1 %v4711_v44 }
 0x472   : > { %2628 = vmatmul.mubr.msk.f32.gmra.mrb[56].mxu1 %vm380_vm2, %v1346_v63 }
 0x473   : > { %1672 = vmatprep.mubr.f32.mxu1 %v4711_v44 }
 0x476   : > { %2629 = vmatmul.mubr.msk.f32.gmra.mrb[58].mxu1 %vm380_vm2, %v1347_v20 }
 0x477   : > { %1678 = vmatprep.mubr.f32.mxu1 %v4711_v44 }
 0x47a   : > { %2630 = vmatmul.mubr.msk.f32.gmra.mrb[60].mxu1 %vm380_vm2, %v1348_v9 }
 0x47b   : > { %1684 = vmatprep.mubr.f32.mxu1 %v4711_v44 }
 0x47e   : > { %2631 = vmatmul.mubr.msk.f32.gmra.mrb[62].mxu1 %vm380_vm2, %v1349_v18 }
 0x47f   : > { %1690 = vmatprep.mubr.f32.mxu1 %v4711_v44 }
 0x482   : > { %2632 = vmatmul.mubr.msk.f32.gmra.mrb[64].mxu1 %vm380_vm2, %v1350_v19 }
 0x483   : > { %1696 = vmatprep.mubr.f32.mxu1 %v4711_v44 }
 0x486   : > { %2633 = vmatmul.mubr.msk.f32.gmra.mrb[66].mxu1 %vm380_vm2, %v1351_v13 }
 0x487   : > { %1702 = vmatprep.mubr.f32.mxu1 %v4711_v44 }
 0x48a   : > { %2634 = vmatmul.mubr.msk.f32.gmra.mrb[68].mxu1 %vm380_vm2, %v1352_v46 }
 0x48b   : > { %1708 = vmatprep.mubr.f32.mxu1 %v4711_v44 }
 0x48e   : > { %2635 = vmatmul.mubr.msk.f32.gmra.mrb[70].mxu1 %vm380_vm2, %v1353_v25 }
 0x4e0   : > { %v1285_v51 = vpop.f32.mrb[64].mxu0 }
 0x4e1   : > { %v1287_v15 = vpop.f32.mrb[65].mxu0 }
 0x4e2   : > { %2636 = vmatprep.subr.msk.mxu0 %vm477_vm1, %v1287_v15 }
 0x4e3   : > { %2637 = vmatpush1.msk.msra.mxu0 %vm477_vm1, %v1285_v51 }
 0x4e4   : > { %v3982_v47 = vpop.f32.mrb[66].mxu0 }
 0x4e5   : > { %v3984_v52 = vpop.f32.mrb[8].mxu1  ;;  %v2355_v49 = vpop.f32.mrb[67].mxu0  ;;  %v2358_v12 = vsel %vm2357_vm3, %v3982_v47, -inf }
 0x4e6   : > { %v3988_v31 = vpop.f32.mrb[9].mxu1  ;;  %2359 = vmax.xlane.f32.xlu0 %v2358_v12 }
 0x4e7   : > { %v1715_v21 = vmax.f32 %v3984_v52, %v3988_v31 }
 0x4e9   : > { %1716 = vmax.xlane.f32.xlu1 %v1715_v21  ;;  %v3992_v60 = vpop.f32.mrb[10].mxu1 }
 0x4ea   : > { %v3994_v37 = vpop.f32.mrb[11].mxu1 }
 0x4eb   : > { %v1718_v29 = vmax.f32 %v3992_v60, %v3994_v37 }
 0x4ed   : > { %v3998_v39 = vpop.f32.mrb[12].mxu1  ;;  %1719 = vmax.xlane.f32.xlu0 %v1718_v29 }
 0x4ee   : > { %v4000_v38 = vpop.f32.mrb[13].mxu1 }
 0x4ef   : > { %v1721_v5 = vmax.f32 %v3998_v39, %v4000_v38 }
 0x4f1   : > { %1722 = vmax.xlane.f32.xlu1 %v1721_v5  ;;  %v4004_v54 = vpop.f32.mrb[14].mxu1 }
 0x4f2   : > { %v4006_v8 = vpop.f32.mrb[15].mxu1 }
 0x4f3   : > { %v1724_v42 = vmax.f32 %v4004_v54, %v4006_v8 }
 0x4f5   : > { %v4010_v40 = vpop.f32.mrb[16].mxu1  ;;  %1725 = vmax.xlane.f32.xlu0 %v1724_v42 }
 0x4f6   : > { %v4012_v30 = vpop.f32.mrb[17].mxu1 }
 0x4f7   : > { %v1727_v16 = vmax.f32 %v4010_v40, %v4012_v30 }
 0x4f9   : > { %1728 = vmax.xlane.f32.xlu1 %v1727_v16  ;;  %v4016_v4 = vpop.f32.mrb[18].mxu1 }
 0x4fa   : > { %v4018_v41 = vpop.f32.mrb[19].mxu1 }
 0x4fb   : > { %v1730_v32 = vmax.f32 %v4016_v4, %v4018_v41 }
 0x4fd   : > { %v4022_v48 = vpop.f32.mrb[20].mxu1  ;;  %1731 = vmax.xlane.f32.xlu0 %v1730_v32 }
 0x4fe   : > { %v4024_v33 = vpop.f32.mrb[21].mxu1 }
 0x4ff   : > { %v1733_v27 = vmax.f32 %v4022_v48, %v4024_v33 }
 0x501   : > { %1734 = vmax.xlane.f32.xlu1 %v1733_v27  ;;  %v4028_v50 = vpop.f32.mrb[22].mxu1 }
 0x502   : > { %v4030_v11 = vpop.f32.mrb[23].mxu1 }
 0x503   : > { %v1736_v34 = vmax.f32 %v4028_v50, %v4030_v11 }
 0x505   : > { %v4034_v14 = vpop.f32.mrb[24].mxu1  ;;  %1737 = vmax.xlane.f32.xlu0 %v1736_v34 }
 0x506   : > { %v4036_v17 = vpop.f32.mrb[25].mxu1 }
 0x507   : > { %v1739_v35 = vmax.f32 %v4034_v14, %v4036_v17 }
 0x509   : > { %1740 = vmax.xlane.f32.xlu1 %v1739_v35  ;;  %v4040_v44 = vpop.f32.mrb[26].mxu1 }
 0x50a   : > { %v4042_v7 = vpop.f32.mrb[27].mxu1 }
 0x50b   : > { %v1742_v0 = vmax.f32 %v4040_v44, %v4042_v7 }
 0x50d   : > { %v4046_v57 = vpop.f32.mrb[28].mxu1  ;;  %1743 = vmax.xlane.f32.xlu0 %v1742_v0 }
 0x50e   : > { %v4048_v56 = vpop.f32.mrb[29].mxu1 }
 0x50f   : > { %v1745_v22 = vmax.f32 %v4046_v57, %v4048_v56 }
 0x511   : > { %1746 = vmax.xlane.f32.xlu1 %v1745_v22  ;;  %v4052_v55 = vpop.f32.mrb[30].mxu1 }
 0x512   : > { %v4054_v58 = vpop.f32.mrb[31].mxu1 }
 0x513   : > { %v1748_v53 = vmax.f32 %v4052_v55, %v4054_v58 }
 0x515   : > { %v4058_v59 = vpop.f32.mrb[32].mxu1  ;;  %1749 = vmax.xlane.f32.xlu0 %v1748_v53 }
 0x516   : > { %v4060_v24 = vpop.f32.mrb[33].mxu1 }
 0x517   : > { %v1751_v3 = vmax.f32 %v4058_v59, %v4060_v24 }
 0x519   : > { %1752 = vmax.xlane.f32.xlu1 %v1751_v3  ;;  %v4064_v1 = vpop.f32.mrb[34].mxu1 }
 0x51a   : > { %v4066_v28 = vpop.f32.mrb[35].mxu1 }
 0x51b   : > { %v1754_v45 = vmax.f32 %v4064_v1, %v4066_v28 }
 0x51d   : > { %v4070_v43 = vpop.f32.mrb[36].mxu1  ;;  %1755 = vmax.xlane.f32.xlu0 %v1754_v45 }
 0x51e   : > { %v4072_v61 = vpop.f32.mrb[37].mxu1 }
 0x51f   : > { %v1757_v10 = vmax.f32 %v4070_v43, %v4072_v61 }
 0x521   : > { %1758 = vmax.xlane.f32.xlu1 %v1757_v10  ;;  %v4076_v23 = vpop.f32.mrb[38].mxu1 }
 0x522   : > { %v4078_v36 = vpop.f32.mrb[39].mxu1 }
 0x523   : > { %v1760_v26 = vmax.f32 %v4076_v23, %v4078_v36 }
 0x525   : > { %v4082_v6 = vpop.f32.mrb[40].mxu1  ;;  %1761 = vmax.xlane.f32.xlu0 %v1760_v26 }
 0x526   : > { %v4084_v62 = vpop.f32.mrb[41].mxu1 }
 0x527   : > { %v1763_v2 = vmax.f32 %v4082_v6, %v4084_v62 }
 0x529   : > { %1764 = vmax.xlane.f32.xlu1 %v1763_v2  ;;  %v4088_v63 = vpop.f32.mrb[42].mxu1 }
 0x52a   : > { %v4090_v20 = vpop.f32.mrb[43].mxu1 }
 0x52b   : > { %v1766_v9 = vmax.f32 %v4088_v63, %v4090_v20 }
 0x52d   : > { %v4094_v18 = vpop.f32.mrb[44].mxu1  ;;  %1767 = vmax.xlane.f32.xlu0 %v1766_v9 }
 0x52e   : > { %v4096_v19 = vpop.f32.mrb[45].mxu1 }
 0x52f   : > { %v1769_v13 = vmax.f32 %v4094_v18, %v4096_v19 }
 0x531   : > { %1770 = vmax.xlane.f32.xlu1 %v1769_v13  ;;  %v4100_v46 = vpop.f32.mrb[46].mxu1 }
 0x532   : > { %v4102_v25 = vpop.f32.mrb[47].mxu1 }
 0x533   : > { %v1772_v51 = vmax.f32 %v4100_v46, %v4102_v25 }
 0x535   : > { %v4106_v15 = vpop.f32.mrb[48].mxu1  ;;  %1773 = vmax.xlane.f32.xlu0 %v1772_v51 }
 0x536   : > { %v4108_v49 = vpop.f32.mrb[49].mxu1 }
 0x537   : > { %v1775_v12 = vmax.f32 %v4106_v15, %v4108_v49 }
 0x539   : > { %1776 = vmax.xlane.f32.xlu1 %v1775_v12  ;;  %v4112_v21 = vpop.f32.mrb[50].mxu1 }
 0x53a   : > { %v4114_v29 = vpop.f32.mrb[51].mxu1 }
 0x53b   : > { %v1778_v5 = vmax.f32 %v4112_v21, %v4114_v29 }
 0x53d   : > { %v4118_v42 = vpop.f32.mrb[52].mxu1  ;;  %1779 = vmax.xlane.f32.xlu0 %v1778_v5 }
 0x53e   : > { %v4120_v16 = vpop.f32.mrb[53].mxu1 }
 0x53f   : > { %v1781_v32 = vmax.f32 %v4118_v42, %v4120_v16 }
 0x541   : > { %1782 = vmax.xlane.f32.xlu1 %v1781_v32  ;;  %v4124_v27 = vpop.f32.mrb[54].mxu1 }
 0x542   : > { %v4126_v34 = vpop.f32.mrb[55].mxu1 }
 0x543   : > { %v1784_v35 = vmax.f32 %v4124_v27, %v4126_v34 }
 0x545   : > { %v4130_v0 = vpop.f32.mrb[56].mxu1  ;;  %1785 = vmax.xlane.f32.xlu0 %v1784_v35 }
 0x546   : > { %v4132_v22 = vpop.f32.mrb[57].mxu1 }
 0x547   : > { %4712 = vst [vmem:[#allocation18_spill] sm:$0xff] %v4132_v22  ;;  %v1787_v53 = vmax.f32 %v4130_v0, %v4132_v22 }
 0x549   : > { %1788 = vmax.xlane.f32.xlu1 %v1787_v53  ;;  %v4136_v3 = vpop.f32.mrb[58].mxu1 }
 0x54a   : > { %4713 = vst [vmem:[#allocation6_spill] sm:$0xff] %v4136_v3  ;;  %v4138_v45 = vpop.f32.mrb[59].mxu1 }
 0x54b   : > { %4714 = vst [vmem:[#allocation8_spill] sm:$0xff] %v4138_v45  ;;  %v1790_v10 = vmax.f32 %v4136_v3, %v4138_v45 }
 0x54d   : > { %v4142_v26 = vpop.f32.mrb[60].mxu1  ;;  %1791 = vmax.xlane.f32.xlu0 %v1790_v10 }
 0x54e   : > { %4715 = vst [vmem:[#allocation5_spill] sm:$0xff] %v4142_v26  ;;  %v4144_v2 = vpop.f32.mrb[61].mxu1 }
 0x54f   : > { %4716 = vst [vmem:[#allocation7_spill] sm:$0xff] %v4144_v2  ;;  %v1793_v9 = vmax.f32 %v4142_v26, %v4144_v2 }
 0x551   : > { %1794 = vmax.xlane.f32.xlu1 %v1793_v9  ;;  %v4148_v13 = vpop.f32.mrb[62].mxu1 }
 0x552   : > { %4717 = vst [vmem:[#allocation10_spill] sm:$0xff] %v4148_v13  ;;  %v4150_v51 = vpop.f32.mrb[63].mxu1 }
 0x553   : > { %4718 = vst [vmem:[#allocation9_spill] sm:$0xff] %v4150_v51  ;;  %v1796_v12 = vmax.f32 %v4148_v13, %v4150_v51 }
 0x555   : > { %v4154_v5 = vpop.f32.mrb[64].mxu1  ;;  %1797 = vmax.xlane.f32.xlu0 %v1796_v12 }
 0x556   : > { %4719 = vst [vmem:[#allocation11_spill] sm:$0xff] %v4154_v5  ;;  %v4156_v32 = vpop.f32.mrb[65].mxu1 }
 0x557   : > { %4720 = vst [vmem:[#allocation12_spill] sm:$0xff] %v4156_v32  ;;  %v1799_v35 = vmax.f32 %v4154_v5, %v4156_v32 }
 0x559   : > { %1800 = vmax.xlane.f32.xlu1 %v1799_v35  ;;  %v4160_v53 = vpop.f32.mrb[66].mxu1 }
 0x55a   : > { %4721 = vst [vmem:[#allocation14_spill] sm:$0xff] %v4160_v53  ;;  %v4162_v10 = vpop.f32.mrb[67].mxu1 }
 0x55b   : > { %4722 = vst [vmem:[#allocation16_spill] sm:$0xff] %v4162_v10  ;;  %v1802_v9 = vmax.f32 %v4160_v53, %v4162_v10 }
 0x55d   : > { %v4166_v2 = vpop.f32.mrb[68].mxu1  ;;  %1803 = vmax.xlane.f32.xlu0 %v1802_v9 }
 0x55e   : > { %4723 = vst [vmem:[#allocation13_spill] sm:$0xff] %v4166_v2  ;;  %v4168_v51 = vpop.f32.mrb[69].mxu1 }
 0x55f   : > { %4724 = vst [vmem:[#allocation15_spill] sm:$0xff] %v4168_v51  ;;  %v1805_v12 = vmax.f32 %v4166_v2, %v4168_v51 }
 0x561   : > { %1806 = vmax.xlane.f32.xlu1 %v1805_v12  ;;  %v4172_v13 = vpop.f32.mrb[70].mxu1 }
 0x562   : > { %4725 = vst [vmem:[#allocation23_spill] sm:$0xff] %v4172_v13  ;;  %v4174_v32 = vpop.f32.mrb[71].mxu1 }
 0x563   : > { %4726 = vst [vmem:[#allocation19_spill] sm:$0xff] %v4174_v32  ;;  %v1808_v35 = vmax.f32 %v4172_v13, %v4174_v32 }
 0x565   : > { %1809 = vmax.xlane.f32.xlu0 %v1808_v35 }
 0x573   : > { %v2360_v5 = vpop.xlane.xlu0 %2359 }
 0x574   : > { %v2361_v10 = vsub.f32 %v3982_v47, %v2360_v5 }
 0x576   : > { %v2362_v53 = vmul.f32 1.442695, %v2361_v10  ;;  %v1717_v26 = vpop.xlane.xlu1 %1716 }
 0x577   : > { %v1811_v9 = vsub.f32 %v3984_v52, %v1717_v26  ;;  %v1812_v45 = vsub.f32 %v3988_v31, %v1717_v26 }
 0x578   : > { %2942 = vpow2.f32 %v2362_v53 }
 0x579   : > { %v1875_v51 = vmul.f32 1.442695, %v1811_v9  ;;  %v1877_v12 = vmul.f32 1.442695, %v1812_v45 }
 0x57a   : > { %v1720_v2 = vpop.xlane.xlu0 %1719 }
 0x57b   : > { %2944 = vpow2.f32 %v1875_v51  ;;  %v1813_v3 = vsub.f32 %v3992_v60, %v1720_v2  ;;  %v1814_v22 = vsub.f32 %v3994_v37, %v1720_v2 }
 0x57c   : > { %2946 = vpow2.f32 %v1877_v12 }
 0x57d   : > { %v1879_v35 = vmul.f32 1.442695, %v1813_v3  ;;  %v1881_v32 = vmul.f32 1.442695, %v1814_v22 }
 0x57e   : > { %v1723_v13 = vpop.xlane.xlu1 %1722 }
 0x57f   : > { %2948 = vpow2.f32 %v1879_v35  ;;  %v1815_v47 = vsub.f32 %v3998_v39, %v1723_v13  ;;  %v1816_v52 = vsub.f32 %v4000_v38, %v1723_v13 }
 0x580   : > { %2950 = vpow2.f32 %v1881_v32 }
 0x581   : > { %v1883_v31 = vmul.f32 1.442695, %v1815_v47  ;;  %v1885_v26 = vmul.f32 1.442695, %v1816_v52 }
 0x582   : > { %v4185_v5 = vpop.eup %2942  ;;  %v1726_v45 = vpop.xlane.xlu0 %1725 }
 0x583   : > { %2952 = vpow2.f32 %v1883_v31  ;;  %v1817_v60 = vsub.f32 %v4004_v54, %v1726_v45  ;;  %v1818_v37 = vsub.f32 %v4006_v8, %v1726_v45  ;;  %v2364_v22 = vsel %vm2357_vm3, %v4185_v5, 0.0 }
 0x584   : > { %2954 = vpow2.f32 %v1885_v26  ;;  %2365 = vadd.xlane.f32.xlu1 %v2364_v22 }
 0x585   : > { %v4191_v3 = vpop.eup %2944  ;;  %v1887_v39 = vmul.f32 1.442695, %v1817_v60  ;;  %v1889_v38 = vmul.f32 1.442695, %v1818_v37 }
 0x586   : > { %v4193_v2 = vpop.eup %2946  ;;  %v1729_v13 = vpop.xlane.xlu1 %1728 }
 0x587   : > { %2956 = vpow2.f32 %v1887_v39  ;;  %v1819_v51 = vsub.f32 %v4010_v40, %v1729_v13  ;;  %v1820_v32 = vsub.f32 %v4012_v30, %v1729_v13  ;;  %v2003_v54 = vadd.f32 %v4193_v2, %v4191_v3 }
 0x588   : > { %2958 = vpow2.f32 %v1889_v38 }
 0x589   : > { %v4199_v8 = vpop.eup %2948  ;;  %v1891_v53 = vmul.f32 1.442695, %v1819_v51  ;;  %v1893_v10 = vmul.f32 1.442695, %v1820_v32  ;;  %2004 = vadd.xlane.f32.xlu0 %v2003_v54 }
 0x58a   : > { %v4201_v9 = vpop.eup %2950  ;;  %v1732_v12 = vpop.xlane.xlu0 %1731 }
 0x58b   : > { %2960 = vpow2.f32 %v1891_v53  ;;  %v1821_v35 = vsub.f32 %v4016_v4, %v1732_v12  ;;  %v1822_v47 = vsub.f32 %v4018_v41, %v1732_v12  ;;  %v2006_v40 = vadd.f32 %v4201_v9, %v4199_v8 }
 0x58c   : > { %2962 = vpow2.f32 %v1893_v10 }
 0x58d   : > { %v4207_v30 = vpop.eup %2952  ;;  %v1895_v52 = vmul.f32 1.442695, %v1821_v35  ;;  %v1897_v31 = vmul.f32 1.442695, %v1822_v47  ;;  %2007 = vadd.xlane.f32.xlu1 %v2006_v40 }
 0x58e   : > { %v4209_v26 = vpop.eup %2954  ;;  %v1735_v45 = vpop.xlane.xlu1 %1734 }
 0x58f   : > { %2964 = vpow2.f32 %v1895_v52  ;;  %v1823_v60 = vsub.f32 %v4022_v48, %v1735_v45  ;;  %v1824_v37 = vsub.f32 %v4024_v33, %v1735_v45  ;;  %v2009_v4 = vadd.f32 %v4209_v26, %v4207_v30 }
 0x590   : > { %2966 = vpow2.f32 %v1897_v31 }
 0x591   : > { %v4215_v41 = vpop.eup %2956  ;;  %v1899_v22 = vmul.f32 1.442695, %v1823_v60  ;;  %v1901_v39 = vmul.f32 1.442695, %v1824_v37  ;;  %2010 = vadd.xlane.f32.xlu0 %v2009_v4 }
 0x592   : > { %v4217_v38 = vpop.eup %2958  ;;  %v1738_v13 = vpop.xlane.xlu0 %1737 }
 0x593   : > { %2968 = vpow2.f32 %v1899_v22  ;;  %v1825_v51 = vsub.f32 %v4028_v50, %v1738_v13  ;;  %v1826_v32 = vsub.f32 %v4030_v11, %v1738_v13  ;;  %v2012_v48 = vadd.f32 %v4217_v38, %v4215_v41 }
 0x594   : > { %2970 = vpow2.f32 %v1901_v39 }
 0x595   : > { %v4223_v33 = vpop.eup %2960  ;;  %v1903_v54 = vmul.f32 1.442695, %v1825_v51  ;;  %v1905_v53 = vmul.f32 1.442695, %v1826_v32  ;;  %2013 = vadd.xlane.f32.xlu1 %v2012_v48 }
 0x596   : > { %v4225_v10 = vpop.eup %2962  ;;  %v1741_v12 = vpop.xlane.xlu1 %1740 }
 0x597   : > { %2972 = vpow2.f32 %v1903_v54  ;;  %v1827_v35 = vsub.f32 %v4034_v14, %v1741_v12  ;;  %v1828_v47 = vsub.f32 %v4036_v17, %v1741_v12  ;;  %v2015_v50 = vadd.f32 %v4225_v10, %v4223_v33 }
 0x598   : > { %2974 = vpow2.f32 %v1905_v53 }
 0x599   : > { %v4231_v11 = vpop.eup %2964  ;;  %v1907_v40 = vmul.f32 1.442695, %v1827_v35  ;;  %v1909_v52 = vmul.f32 1.442695, %v1828_v47  ;;  %2016 = vadd.xlane.f32.xlu0 %v2015_v50 }
 0x59a   : > { %v4233_v31 = vpop.eup %2966  ;;  %v1744_v45 = vpop.xlane.xlu0 %1743 }
 0x59b   : > { %2976 = vpow2.f32 %v1907_v40  ;;  %v1829_v60 = vsub.f32 %v4040_v44, %v1744_v45  ;;  %v1830_v37 = vsub.f32 %v4042_v7, %v1744_v45  ;;  %v2018_v14 = vadd.f32 %v4233_v31, %v4231_v11 }
 0x59c   : > { %2978 = vpow2.f32 %v1909_v52 }
 0x59d   : > { %v4239_v17 = vpop.eup %2968  ;;  %v1911_v4 = vmul.f32 1.442695, %v1829_v60  ;;  %v1913_v22 = vmul.f32 1.442695, %v1830_v37  ;;  %2019 = vadd.xlane.f32.xlu1 %v2018_v14 }
 0x59e   : > { %v4241_v39 = vpop.eup %2970  ;;  %v1747_v13 = vpop.xlane.xlu1 %1746 }
 0x59f   : > { %2980 = vpow2.f32 %v1911_v4  ;;  %v1831_v51 = vsub.f32 %v4046_v57, %v1747_v13  ;;  %v1832_v32 = vsub.f32 %v4048_v56, %v1747_v13  ;;  %v2021_v44 = vadd.f32 %v4241_v39, %v4239_v17 }
 0x5a0   : > { %2982 = vpow2.f32 %v1913_v22 }
 0x5a1   : > { %v4247_v7 = vpop.eup %2972  ;;  %v1915_v48 = vmul.f32 1.442695, %v1831_v51  ;;  %v1917_v54 = vmul.f32 1.442695, %v1832_v32  ;;  %2022 = vadd.xlane.f32.xlu0 %v2021_v44 }
 0x5a2   : > { %v4249_v53 = vpop.eup %2974  ;;  %v1750_v12 = vpop.xlane.xlu0 %1749 }
 0x5a3   : > { %2984 = vpow2.f32 %v1915_v48  ;;  %v1833_v35 = vsub.f32 %v4052_v55, %v1750_v12  ;;  %v1834_v47 = vsub.f32 %v4054_v58, %v1750_v12  ;;  %v2024_v57 = vadd.f32 %v4249_v53, %v4247_v7 }
 0x5a4   : > { %2986 = vpow2.f32 %v1917_v54 }
 0x5a5   : > { %v4255_v56 = vpop.eup %2976  ;;  %v1919_v50 = vmul.f32 1.442695, %v1833_v35  ;;  %v1921_v40 = vmul.f32 1.442695, %v1834_v47  ;;  %2025 = vadd.xlane.f32.xlu1 %v2024_v57 }
 0x5a6   : > { %v4257_v52 = vpop.eup %2978  ;;  %v1753_v45 = vpop.xlane.xlu1 %1752 }
 0x5a7   : > { %2988 = vpow2.f32 %v1919_v50  ;;  %v1835_v60 = vsub.f32 %v4058_v59, %v1753_v45  ;;  %v1836_v37 = vsub.f32 %v4060_v24, %v1753_v45  ;;  %v2027_v55 = vadd.f32 %v4257_v52, %v4255_v56 }
 0x5a8   : > { %2990 = vpow2.f32 %v1921_v40 }
 0x5a9   : > { %v4263_v58 = vpop.eup %2980  ;;  %v1923_v14 = vmul.f32 1.442695, %v1835_v60  ;;  %v1925_v4 = vmul.f32 1.442695, %v1836_v37  ;;  %2028 = vadd.xlane.f32.xlu0 %v2027_v55 }
 0x5aa   : > { %v4265_v22 = vpop.eup %2982  ;;  %v1756_v13 = vpop.xlane.xlu0 %1755 }
 0x5ab   : > { %2992 = vpow2.f32 %v1923_v14  ;;  %v1837_v51 = vsub.f32 %v4064_v1, %v1756_v13  ;;  %v1838_v32 = vsub.f32 %v4066_v28, %v1756_v13  ;;  %v2030_v59 = vadd.f32 %v4265_v22, %v4263_v58 }
 0x5ac   : > { %2994 = vpow2.f32 %v1925_v4 }
 0x5ad   : > { %v4271_v24 = vpop.eup %2984  ;;  %v1927_v44 = vmul.f32 1.442695, %v1837_v51  ;;  %v1929_v48 = vmul.f32 1.442695, %v1838_v32  ;;  %2031 = vadd.xlane.f32.xlu1 %v2030_v59 }
 0x5ae   : > { %v4273_v54 = vpop.eup %2986  ;;  %v1759_v12 = vpop.xlane.xlu1 %1758 }
 0x5af   : > { %2996 = vpow2.f32 %v1927_v44  ;;  %v1839_v35 = vsub.f32 %v4070_v43, %v1759_v12  ;;  %v1840_v47 = vsub.f32 %v4072_v61, %v1759_v12  ;;  %v2033_v1 = vadd.f32 %v4273_v54, %v4271_v24 }
 0x5b0   : > { %2998 = vpow2.f32 %v1929_v48 }
 0x5b1   : > { %v4279_v28 = vpop.eup %2988  ;;  %v1931_v57 = vmul.f32 1.442695, %v1839_v35  ;;  %v1933_v50 = vmul.f32 1.442695, %v1840_v47  ;;  %2034 = vadd.xlane.f32.xlu0 %v2033_v1 }
 0x5b2   : > { %v4281_v40 = vpop.eup %2990  ;;  %v1762_v45 = vpop.xlane.xlu0 %1761 }
 0x5b3   : > { %3000 = vpow2.f32 %v1931_v57  ;;  %v1841_v60 = vsub.f32 %v4076_v23, %v1762_v45  ;;  %v1842_v37 = vsub.f32 %v4078_v36, %v1762_v45  ;;  %v2036_v43 = vadd.f32 %v4281_v40, %v4279_v28 }
 0x5b4   : > { %3002 = vpow2.f32 %v1933_v50 }
 0x5b5   : > { %v4287_v61 = vpop.eup %2992  ;;  %v1935_v55 = vmul.f32 1.442695, %v1841_v60  ;;  %v1937_v14 = vmul.f32 1.442695, %v1842_v37  ;;  %2037 = vadd.xlane.f32.xlu1 %v2036_v43 }
 0x5b6   : > { %v4289_v4 = vpop.eup %2994  ;;  %v1765_v13 = vpop.xlane.xlu1 %1764 }
 0x5b7   : > { %3004 = vpow2.f32 %v1935_v55  ;;  %v1843_v51 = vsub.f32 %v4082_v6, %v1765_v13  ;;  %v1844_v32 = vsub.f32 %v4084_v62, %v1765_v13  ;;  %v2039_v23 = vadd.f32 %v4289_v4, %v4287_v61 }
 0x5b8   : > { %3006 = vpow2.f32 %v1937_v14 }
 0x5b9   : > { %v4295_v36 = vpop.eup %2996  ;;  %v1939_v59 = vmul.f32 1.442695, %v1843_v51  ;;  %v1941_v44 = vmul.f32 1.442695, %v1844_v32  ;;  %2040 = vadd.xlane.f32.xlu0 %v2039_v23 }
 0x5ba   : > { %v4297_v48 = vpop.eup %2998  ;;  %v1768_v12 = vpop.xlane.xlu0 %1767 }
 0x5bb   : > { %3008 = vpow2.f32 %v1939_v59  ;;  %v1845_v35 = vsub.f32 %v4088_v63, %v1768_v12  ;;  %v1846_v47 = vsub.f32 %v4090_v20, %v1768_v12  ;;  %v2042_v6 = vadd.f32 %v4297_v48, %v4295_v36 }
 0x5bc   : > { %3010 = vpow2.f32 %v1941_v44 }
 0x5bd   : > { %v4303_v62 = vpop.eup %3000  ;;  %v1943_v1 = vmul.f32 1.442695, %v1845_v35  ;;  %v1945_v57 = vmul.f32 1.442695, %v1846_v47  ;;  %2043 = vadd.xlane.f32.xlu1 %v2042_v6 }
 0x5be   : > { %v4305_v50 = vpop.eup %3002  ;;  %v1771_v45 = vpop.xlane.xlu1 %1770 }
 0x5bf   : > { %3012 = vpow2.f32 %v1943_v1  ;;  %v1847_v60 = vsub.f32 %v4094_v18, %v1771_v45  ;;  %v1848_v37 = vsub.f32 %v4096_v19, %v1771_v45  ;;  %v2045_v63 = vadd.f32 %v4305_v50, %v4303_v62 }
 0x5c0   : > { %3014 = vpow2.f32 %v1945_v57 }
 0x5c1   : > { %v4311_v20 = vpop.eup %3004  ;;  %v1947_v43 = vmul.f32 1.442695, %v1847_v60  ;;  %v1949_v55 = vmul.f32 1.442695, %v1848_v37  ;;  %2046 = vadd.xlane.f32.xlu0 %v2045_v63 }
 0x5c2   : > { %v4313_v14 = vpop.eup %3006  ;;  %v1774_v13 = vpop.xlane.xlu0 %1773 }
 0x5c3   : > { %3016 = vpow2.f32 %v1947_v43  ;;  %v1849_v51 = vsub.f32 %v4100_v46, %v1774_v13  ;;  %v1850_v32 = vsub.f32 %v4102_v25, %v1774_v13  ;;  %v2048_v18 = vadd.f32 %v4313_v14, %v4311_v20 }
 0x5c4   : > { %3018 = vpow2.f32 %v1949_v55 }
 0x5c5   : > { %v4319_v19 = vpop.eup %3008  ;;  %v1951_v23 = vmul.f32 1.442695, %v1849_v51  ;;  %v1953_v59 = vmul.f32 1.442695, %v1850_v32  ;;  %2049 = vadd.xlane.f32.xlu1 %v2048_v18 }
 0x5c6   : > { %v4321_v44 = vpop.eup %3010  ;;  %v1777_v12 = vpop.xlane.xlu1 %1776 }
 0x5c7   : > { %3020 = vpow2.f32 %v1951_v23  ;;  %v1851_v35 = vsub.f32 %v4106_v15, %v1777_v12  ;;  %v1852_v47 = vsub.f32 %v4108_v49, %v1777_v12  ;;  %v2051_v46 = vadd.f32 %v4321_v44, %v4319_v19 }
 0x5c8   : > { %3022 = vpow2.f32 %v1953_v59 }
 0x5c9   : > { %v4327_v25 = vpop.eup %3012  ;;  %v1955_v6 = vmul.f32 1.442695, %v1851_v35  ;;  %v1957_v1 = vmul.f32 1.442695, %v1852_v47  ;;  %2052 = vadd.xlane.f32.xlu0 %v2051_v46 }
 0x5ca   : > { %v4329_v57 = vpop.eup %3014  ;;  %v1780_v45 = vpop.xlane.xlu0 %1779 }
 0x5cb   : > { %3024 = vpow2.f32 %v1955_v6  ;;  %v1853_v60 = vsub.f32 %v4112_v21, %v1780_v45  ;;  %v1854_v37 = vsub.f32 %v4114_v29, %v1780_v45  ;;  %v2054_v15 = vadd.f32 %v4329_v57, %v4327_v25 }
 0x5cc   : > { %3026 = vpow2.f32 %v1957_v1 }
 0x5cd   : > { %v4335_v49 = vpop.eup %3016  ;;  %v1959_v63 = vmul.f32 1.442695, %v1853_v60  ;;  %v1961_v43 = vmul.f32 1.442695, %v1854_v37  ;;  %2055 = vadd.xlane.f32.xlu1 %v2054_v15  ;;  %v4727_v37 = vld [vmem:[#allocation18_spill] sm:$0xff] }
 0x5ce   : > { %v4337_v55 = vpop.eup %3018  ;;  %v1783_v13 = vpop.xlane.xlu1 %1782 }
 0x5cf   : > { %3028 = vpow2.f32 %v1959_v63  ;;  %v1855_v51 = vsub.f32 %v4118_v42, %v1783_v13  ;;  %v1856_v32 = vsub.f32 %v4120_v16, %v1783_v13  ;;  %v2057_v21 = vadd.f32 %v4337_v55, %v4335_v49 }
 0x5d0   : > { %3030 = vpow2.f32 %v1961_v43 }
 0x5d1   : > { %v4343_v29 = vpop.eup %3020  ;;  %v1963_v18 = vmul.f32 1.442695, %v1855_v51  ;;  %v1965_v23 = vmul.f32 1.442695, %v1856_v32  ;;  %2058 = vadd.xlane.f32.xlu0 %v2057_v21  ;;  %v4728_v32 = vld [vmem:[#allocation6_spill] sm:$0xff] }
 0x5d2   : > { %v4345_v59 = vpop.eup %3022  ;;  %v1786_v12 = vpop.xlane.xlu0 %1785 }
 0x5d3   : > { %3032 = vpow2.f32 %v1963_v18  ;;  %v1857_v35 = vsub.f32 %v4124_v27, %v1786_v12  ;;  %v1858_v47 = vsub.f32 %v4126_v34, %v1786_v12  ;;  %v2060_v42 = vadd.f32 %v4345_v59, %v4343_v29  ;;  %v4729_v18 = vld [vmem:[#allocation8_spill] sm:$0xff] }
 0x5d4   : > { %3034 = vpow2.f32 %v1965_v23 }
 0x5d5   : > { %v4351_v16 = vpop.eup %3024  ;;  %v1967_v46 = vmul.f32 1.442695, %v1857_v35  ;;  %v1969_v6 = vmul.f32 1.442695, %v1858_v47  ;;  %2061 = vadd.xlane.f32.xlu1 %v2060_v42 }
 0x5d6   : > { %v4353_v1 = vpop.eup %3026  ;;  %v1789_v45 = vpop.xlane.xlu1 %1788 }
 0x5d7   : > { %3036 = vpow2.f32 %v1967_v46  ;;  %v1859_v60 = vsub.f32 %v4130_v0, %v1789_v45  ;;  %v1860_v15 = vsub.f32 %v4727_v37, %v1789_v45  ;;  %v2063_v27 = vadd.f32 %v4353_v1, %v4351_v16 }
 0x5d8   : > { %3038 = vpow2.f32 %v1969_v6  ;;  %v4731_v6 = vld [vmem:[#allocation5_spill] sm:$0xff] }
 0x5d9   : > { %v4359_v34 = vpop.eup %3028  ;;  %v1971_v63 = vmul.f32 1.442695, %v1859_v60  ;;  %v1973_v43 = vmul.f32 1.442695, %v1860_v15  ;;  %2064 = vadd.xlane.f32.xlu0 %v2063_v27  ;;  %v4732_v60 = vld [vmem:[#allocation7_spill] sm:$0xff] }
 0x5da   : > { %v4361_v13 = vpop.eup %3030  ;;  %v1792_v51 = vpop.xlane.xlu0 %1791 }
 0x5db   : > { %3040 = vpow2.f32 %v1971_v63  ;;  %v1861_v21 = vsub.f32 %v4728_v32, %v1792_v51  ;;  %v1862_v23 = vsub.f32 %v4729_v18, %v1792_v51  ;;  %v2066_v0 = vadd.f32 %v4361_v13, %v4359_v34 }
 0x5dc   : > { %3042 = vpow2.f32 %v1973_v43 }
 0x5dd   : > { %v4367_v12 = vpop.eup %3032  ;;  %v1975_v35 = vmul.f32 1.442695, %v1861_v21  ;;  %v1977_v47 = vmul.f32 1.442695, %v1862_v23  ;;  %2067 = vadd.xlane.f32.xlu1 %v2066_v0  ;;  %v4735_v21 = vld [vmem:[#allocation10_spill] sm:$0xff]  ;;  %v4736_v23 = vld [vmem:[#allocation9_spill] sm:$0xff] }
 0x5de   : > { %v4369_v42 = vpop.eup %3034  ;;  %v1795_v46 = vpop.xlane.xlu1 %1794 }
 0x5df   : > { %4730 = vst [vmem:[#allocation21_spill] sm:$0xff] %v4369_v42  ;;  %3044 = vpow2.f32 %v1975_v35  ;;  %v1863_v45 = vsub.f32 %v4731_v6, %v1795_v46  ;;  %v1864_v37 = vsub.f32 %v4732_v60, %v1795_v46  ;;  %v2069_v15 = vadd.f32 %v4369_v42, %v4367_v12 }
 0x5e0   : > { %3046 = vpow2.f32 %v1977_v47 }
 0x5e1   : > { %v4375_v27 = vpop.eup %3036  ;;  %v1979_v63 = vmul.f32 1.442695, %v1863_v45  ;;  %v1981_v43 = vmul.f32 1.442695, %v1864_v37  ;;  %2070 = vadd.xlane.f32.xlu0 %v2069_v15  ;;  %v4739_v37 = vld [vmem:[#allocation11_spill] sm:$0xff] }
 0x5e2   : > { %4733 = vst [vmem:[#allocation17_spill] sm:$0xff] %v4375_v27  ;;  %v4377_v51 = vpop.eup %3038  ;;  %v1798_v32 = vpop.xlane.xlu0 %1797 }
 0x5e3   : > { %4734 = vst [vmem:[#allocation20_spill] sm:$0xff] %v4377_v51  ;;  %3048 = vpow2.f32 %v1979_v63  ;;  %v1865_v18 = vsub.f32 %v4735_v21, %v1798_v32  ;;  %v1866_v0 = vsub.f32 %v4736_v23, %v1798_v32  ;;  %v2072_v35 = vadd.f32 %v4377_v51, %v4375_v27  ;;  %v4740_v63 = vld [vmem:[#allocation12_spill] sm:$0xff] }
 0x5e4   : > { %3050 = vpow2.f32 %v1981_v43 }
 0x5e5   : > { %v4383_v46 = vpop.eup %3040  ;;  %v1983_v47 = vmul.f32 1.442695, %v1865_v18  ;;  %v1985_v6 = vmul.f32 1.442695, %v1866_v0  ;;  %2073 = vadd.xlane.f32.xlu1 %v2072_v35  ;;  %v4743_v35 = vld [vmem:[#allocation14_spill] sm:$0xff] }
 0x5e6   : > { %4737 = vst [vmem:[#allocation22_spill] sm:$0xff] %v4383_v46  ;;  %v4385_v45 = vpop.eup %3042  ;;  %v1801_v60 = vpop.xlane.xlu1 %1800 }
 0x5e7   : > { %4738 = vst [vmem:[#allocation24_spill] sm:$0xff] %v4385_v45  ;;  %3052 = vpow2.f32 %v1983_v47  ;;  %v1867_v15 = vsub.f32 %v4739_v37, %v1801_v60  ;;  %v1868_v42 = vsub.f32 %v4740_v63, %v1801_v60  ;;  %v2075_v32 = vadd.f32 %v4385_v45, %v4383_v46  ;;  %v4744_v47 = vld [vmem:[#allocation16_spill] sm:$0xff] }
 0x5e8   : > { %3054 = vpow2.f32 %v1985_v6 }
 0x5e9   : > { %v4391_v21 = vpop.eup %3044  ;;  %v1987_v43 = vmul.f32 1.442695, %v1867_v15  ;;  %v1989_v23 = vmul.f32 1.442695, %v1868_v42  ;;  %2076 = vadd.xlane.f32.xlu0 %v2075_v32  ;;  %v4745_v32 = vld [vmem:[#allocation13_spill] sm:$0xff] }
 0x5ea   : > { %4741 = vst [vmem:[#allocation18_spill] sm:$0xff] %v4391_v21  ;;  %v4393_v18 = vpop.eup %3046  ;;  %v1804_v0 = vpop.xlane.xlu0 %1803 }
 0x5eb   : > { %4742 = vst [vmem:[#allocation6_spill] sm:$0xff] %v4393_v18  ;;  %3056 = vpow2.f32 %v1987_v43  ;;  %v1869_v51 = vsub.f32 %v4743_v35, %v1804_v0  ;;  %v1870_v27 = vsub.f32 %v4744_v47, %v1804_v0  ;;  %v2078_v60 = vadd.f32 %v4393_v18, %v4391_v21  ;;  %v4746_v43 = vld [vmem:[#allocation15_spill] sm:$0xff] }
 0x5ec   : > { %3058 = vpow2.f32 %v1989_v23 }
 0x5ed   : > { %v4399_v37 = vpop.eup %3048  ;;  %v1991_v6 = vmul.f32 1.442695, %v1869_v51  ;;  %v1993_v63 = vmul.f32 1.442695, %v1870_v27  ;;  %2079 = vadd.xlane.f32.xlu1 %v2078_v60  ;;  %v4749_v60 = vld [vmem:[#allocation23_spill] sm:$0xff] }
 0x5ee   : > { %v4401_v15 = vpop.eup %3050  ;;  %v1807_v42 = vpop.xlane.xlu1 %1806 }
 0x5ef   : > { %3060 = vpow2.f32 %v1991_v6  ;;  %v1871_v45 = vsub.f32 %v4745_v32, %v1807_v42  ;;  %v1872_v46 = vsub.f32 %v4746_v43, %v1807_v42  ;;  %v2081_v0 = vadd.f32 %v4401_v15, %v4399_v37  ;;  %v4750_v6 = vld [vmem:[#allocation19_spill] sm:$0xff] }
 0x5f0   : > { %3062 = vpow2.f32 %v1993_v63 }
 0x5f1   : > { %v4407_v35 = vpop.eup %3052  ;;  %v1995_v23 = vmul.f32 1.442695, %v1871_v45  ;;  %v1997_v47 = vmul.f32 1.442695, %v1872_v46  ;;  %2082 = vadd.xlane.f32.xlu0 %v2081_v0 }
 0x5f2   : > { %4747 = vst [vmem:[#allocation8_spill] sm:$0xff] %v4407_v35  ;;  %v4409_v51 = vpop.eup %3054  ;;  %v1810_v27 = vpop.xlane.xlu0 %1809 }
 0x5f3   : > { %4748 = vst [vmem:[#allocation5_spill] sm:$0xff] %v4409_v51  ;;  %3064 = vpow2.f32 %v1995_v23  ;;  %v1873_v18 = vsub.f32 %v4749_v60, %v1810_v27  ;;  %v1874_v21 = vsub.f32 %v4750_v6, %v1810_v27  ;;  %v2084_v42 = vadd.f32 %v4409_v51, %v4407_v35 }
 0x5f4   : > { %3066 = vpow2.f32 %v1997_v47 }
 0x5f5   : > { %v4415_v32 = vpop.eup %3056  ;;  %v1999_v63 = vmul.f32 1.442695, %v1873_v18  ;;  %v2001_v43 = vmul.f32 1.442695, %v1874_v21  ;;  %2085 = vadd.xlane.f32.xlu1 %v2084_v42 }
 0x5f6   : > { %4751 = vst [vmem:[#allocation7_spill] sm:$0xff] %v4415_v32  ;;  %v4417_v45 = vpop.eup %3058 }
 0x5f7   : > { %4752 = vst [vmem:[#allocation10_spill] sm:$0xff] %v4417_v45  ;;  %3068 = vpow2.f32 %v1999_v63  ;;  %v2087_v46 = vadd.f32 %v4417_v45, %v4415_v32  ;;  %v2394_v63 = vld [vmem:[%s4572_s3] sm:$0xff] }
 0x5f8   : > { %3070 = vpow2.f32 %v2001_v43  ;;  %2638 = vmatmul.mubr.msk.f32.vlgmr.msra.gmra.mrb[68].mxu0 %vm380_vm2, %v2394_v63 }
 0x5f9   : > { %v4421_v0 = vpop.eup %3060  ;;  %2088 = vadd.xlane.f32.xlu0 %v2087_v46 }
 0x5fa   : > { %4753 = vst [vmem:[#allocation9_spill] sm:$0xff] %v4421_v0  ;;  %v4423_v23 = vpop.eup %3062 }
 0x5fb   : > { %4754 = vst [vmem:[#allocation11_spill] sm:$0xff] %v4423_v23  ;;  %v2090_v47 = vadd.f32 %v4423_v23, %v4421_v0 }
 0x5fd   : > { %v4427_v27 = vpop.eup %3064  ;;  %2091 = vadd.xlane.f32.xlu1 %v2090_v47 }
 0x5fe   : > { %4755 = vst [vmem:[#allocation12_spill] sm:$0xff] %v4427_v27  ;;  %v4429_v21 = vpop.eup %3066 }
 0x5ff   : > { %4756 = vst [vmem:[#allocation14_spill] sm:$0xff] %v4429_v21  ;;  %v2093_v18 = vadd.f32 %v4429_v21, %v4427_v27 }
 0x601   : > { %v4433_v60 = vpop.eup %3068  ;;  %2094 = vadd.xlane.f32.xlu0 %v2093_v18 }
 0x602   : > { %4757 = vst [vmem:[#allocation16_spill] sm:$0xff] %v4433_v60  ;;  %v4435_v6 = vpop.eup %3070 }
 0x603   : > { %4758 = vst [vmem:[#allocation13_spill] sm:$0xff] %v4435_v6  ;;  %v2096_v42 = vadd.f32 %v4435_v6, %v4433_v60 }
 0x605   : > { %2097 = vadd.xlane.f32.xlu1 %v2096_v42 }
 0x611   : > { %v2366_v43 = vpop.xlane.xlu1 %2365 }
 0x612   : > { %3072 = vrcp.f32 %v2366_v43 }
 0x616   : > { %v2005_v43 = vpop.xlane.xlu0 %2004 }
 0x61a   : > { %v2008_v60 = vpop.xlane.xlu1 %2007 }
 0x61b   : > { %3074 = vrcp.f32 %v2008_v60 }
 0x61c   : > { %v3073_v46 = vpop.eup %3072  ;;  %3076 = vrcp.f32 %v2005_v43 }
 0x61d   : > { %v2368_v47 = vmul.f32 %v3073_v46, %v4185_v5 }
 0x61e   : > { %v2011_v5 = vpop.xlane.xlu0 %2010 }
 0x61f   : > { %v2369_v21 = vsel %vm2357_vm3, %v2368_v47, 0.0  ;;  %3078 = vrcp.f32 %v2011_v5 }
 0x620   : > { %v2370_v18 = vrot.slane %v2369_v21, 4 }
 0x622   : > { %v2371_v27 = vadd.f32 %v2370_v18, %v2369_v21  ;;  %v2014_v46 = vpop.xlane.xlu1 %2013 }
 0x623   : > { %3080 = vrcp.f32 %v2014_v46 }
 0x624   : > { %v2372_v23 = vrot.slane %v2371_v27, 2 }
 0x626   : > { %v2373_v0 = vadd.f32 %v2372_v23, %v2371_v27  ;;  %v2017_v21 = vpop.xlane.xlu0 %2016  ;;  %v3075_v27 = vpop.eup %3074 }
 0x627   : > { %3082 = vrcp.f32 %v2017_v21  ;;  %v3077_v47 = vpop.eup %3076  ;;  %v2134_v60 = vmul.f32 %v3075_v27, %v4201_v9 }
 0x628   : > { %v2374_v45 = vrot.slane %v2373_v0, 1  ;;  %v2131_v5 = vmul.f32 %v3077_v47, %v4191_v3  ;;  %v2132_v46 = vmul.f32 %v3077_v47, %v4193_v2 }
 0x62a   : > { %v4445_v6 = vadd.f32 %v2374_v45, %v2373_v0  ;;  %v2020_v23 = vpop.xlane.xlu1 %2019 }
 0x62b   : > { %3084 = vrcp.f32 %v2020_v23 }
 0x62c   : > { %4759 = vst [vmem:[#allocation15_spill] sm:$0xff] %v4445_v6  ;;  %v2376_v42 = vsel %vm380_vm2, %v4445_v6, -inf  ;;  %v2379_v63 = vsel %vm380_vm2, %v4445_v6, inf }
 0x62d   : > { %2377 = vmax.xlane.f32.xlu0 %v2376_v42  ;;  %2380 = vmin.xlane.f32.xlu1 %v2379_v63  ;;  %v3079_v42 = vpop.eup %3078  ;;  %v2133_v63 = vmul.f32 %v3075_v27, %v4199_v8 }
 0x62e   : > { %v2023_v45 = vpop.xlane.xlu0 %2022  ;;  %v3081_v6 = vpop.eup %3080  ;;  %v2135_v21 = vmul.f32 %v3079_v42, %v4207_v30  ;;  %v2136_v23 = vmul.f32 %v3079_v42, %v4209_v26 }
 0x62f   : > { %3086 = vrcp.f32 %v2023_v45  ;;  %v2195_v51 = vadd.f32 %v2133_v63, %v2131_v5  ;;  %v2137_v8 = vmul.f32 %v3081_v6, %v4215_v41  ;;  %v2138_v9 = vmul.f32 %v3081_v6, %v4217_v38 }
 0x631   : > { %v3083_v32 = vpop.eup %3082 }
 0x632   : > { %v2026_v0 = vpop.xlane.xlu1 %2025  ;;  %v2139_v2 = vmul.f32 %v3083_v32, %v4223_v33  ;;  %v2140_v30 = vmul.f32 %v3083_v32, %v4225_v10 }
 0x633   : > { %3088 = vrcp.f32 %v2026_v0  ;;  %v2232_v0 = vadd.f32 %v2134_v60, %v2132_v46 }
 0x635   : > { %v3085_v35 = vpop.eup %3084  ;;  %v2233_v3 = vadd.f32 %v2232_v0, %v2136_v23 }
 0x636   : > { %v2029_v18 = vpop.xlane.xlu0 %2028  ;;  %v2141_v63 = vmul.f32 %v3085_v35, %v4231_v11  ;;  %v2142_v41 = vmul.f32 %v3085_v35, %v4233_v31 }
 0x637   : > { %3090 = vrcp.f32 %v2029_v18  ;;  %v2196_v18 = vadd.f32 %v2195_v51, %v2135_v21 }
 0x639   : > { %v3087_v26 = vpop.eup %3086  ;;  %v2197_v42 = vadd.f32 %v2196_v18, %v2137_v8 }
 0x63a   : > { %v2032_v43 = vpop.xlane.xlu1 %2031  ;;  %v2143_v51 = vmul.f32 %v3087_v26, %v4239_v17  ;;  %v2144_v33 = vmul.f32 %v3087_v26, %v4241_v39 }
 0x63b   : > { %3092 = vrcp.f32 %v2032_v43  ;;  %v2234_v43 = vadd.f32 %v2233_v3, %v2138_v9  ;;  %v2198_v6 = vadd.f32 %v2197_v42, %v2139_v2 }
 0x63d   : > { %v3089_v38 = vpop.eup %3088  ;;  %v2235_v5 = vadd.f32 %v2234_v43, %v2140_v30  ;;  %v2199_v32 = vadd.f32 %v2198_v6, %v2141_v63 }
 0x63e   : > { %v2035_v45 = vpop.xlane.xlu0 %2034  ;;  %v2145_v23 = vmul.f32 %v3089_v38, %v4247_v7  ;;  %v2146_v11 = vmul.f32 %v3089_v38, %v4249_v53 }
 0x63f   : > { %3094 = vrcp.f32 %v2035_v45  ;;  %v2236_v21 = vadd.f32 %v2235_v5, %v2142_v41  ;;  %v2200_v35 = vadd.f32 %v2199_v32, %v2143_v51 }
 0x641   : > { %v3091_v10 = vpop.eup %3090  ;;  %v2237_v0 = vadd.f32 %v2236_v21, %v2144_v33 }
 0x642   : > { %v2038_v27 = vpop.xlane.xlu1 %2037  ;;  %v2147_v8 = vmul.f32 %v3091_v10, %v4255_v56  ;;  %v2148_v17 = vmul.f32 %v3091_v10, %v4257_v52 }
 0x643   : > { %3096 = vrcp.f32 %v2038_v27  ;;  %v2201_v27 = vadd.f32 %v2200_v35, %v2145_v23  ;;  %v2238_v18 = vadd.f32 %v2237_v0, %v2146_v11 }
 0x645   : > { %v3093_v31 = vpop.eup %3092  ;;  %v2202_v30 = vadd.f32 %v2201_v27, %v2147_v8 }
 0x646   : > { %v2041_v47 = vpop.xlane.xlu0 %2040  ;;  %v2149_v3 = vmul.f32 %v3093_v31, %v4263_v58  ;;  %v2150_v7 = vmul.f32 %v3093_v31, %v4265_v22 }
 0x647   : > { %3098 = vrcp.f32 %v2041_v47  ;;  %v2239_v47 = vadd.f32 %v2238_v18, %v2148_v17 }
 0x648   : > { %v2203_v43 = vadd.f32 %v2202_v30, %v2149_v3 }
 0x649   : > { %v3095_v39 = vpop.eup %3094  ;;  %v2240_v63 = vadd.f32 %v2239_v47, %v2150_v7 }
 0x64a   : > { %v2044_v60 = vpop.xlane.xlu1 %2043  ;;  %v2151_v26 = vmul.f32 %v3095_v39, %v4271_v24  ;;  %v2152_v56 = vmul.f32 %v3095_v39, %v4273_v54 }
 0x64b   : > { %3100 = vrcp.f32 %v2044_v60 }
 0x64c   : > { %v2204_v38 = vadd.f32 %v2203_v43, %v2151_v26  ;;  %v2241_v6 = vadd.f32 %v2240_v63, %v2152_v56 }
 0x64d   : > { %v3097_v53 = vpop.eup %3096 }
 0x64e   : > { %v2047_v46 = vpop.xlane.xlu0 %2046  ;;  %v2153_v41 = vmul.f32 %v3097_v53, %v4279_v28  ;;  %v2154_v58 = vmul.f32 %v3097_v53, %v4281_v40 }
 0x64f   : > { %3102 = vrcp.f32 %v2047_v46 }
 0x650   : > { %v2205_v33 = vadd.f32 %v2204_v38, %v2153_v41  ;;  %v2242_v46 = vadd.f32 %v2241_v6, %v2154_v58 }
 0x651   : > { %v3099_v52 = vpop.eup %3098 }
 0x652   : > { %v2050_v45 = vpop.xlane.xlu1 %2049  ;;  %v2155_v5 = vmul.f32 %v3099_v52, %v4287_v61  ;;  %v2156_v24 = vmul.f32 %v3099_v52, %v4289_v4 }
 0x653   : > { %3104 = vrcp.f32 %v2050_v45 }
 0x654   : > { %v2206_v21 = vadd.f32 %v2205_v33, %v2155_v5  ;;  %v2243_v23 = vadd.f32 %v2242_v46, %v2156_v24 }
 0x655   : > { %v3101_v22 = vpop.eup %3100 }
 0x656   : > { %v2053_v9 = vpop.xlane.xlu0 %2052  ;;  %v2157_v10 = vmul.f32 %v3101_v22, %v4295_v36  ;;  %v2158_v28 = vmul.f32 %v3101_v22, %v4297_v48 }
 0x657   : > { %3106 = vrcp.f32 %v2053_v9 }
 0x658   : > { %v2207_v31 = vadd.f32 %v2206_v21, %v2157_v10  ;;  %v2244_v35 = vadd.f32 %v2243_v23, %v2158_v28  ;;  %v4761_v28 = vld [vmem:[#allocation17_spill] sm:$0xff] }
 0x659   : > { %v3103_v54 = vpop.eup %3102 }
 0x65a   : > { %v2056_v2 = vpop.xlane.xlu1 %2055  ;;  %v2159_v11 = vmul.f32 %v3103_v54, %v4303_v62  ;;  %v2160_v61 = vmul.f32 %v3103_v54, %v4305_v50  ;;  %v4760_v54 = vld [vmem:[#allocation21_spill] sm:$0xff] }
 0x65b   : > { %3108 = vrcp.f32 %v2056_v2 }
 0x65c   : > { %v2208_v17 = vadd.f32 %v2207_v31, %v2159_v11  ;;  %v2245_v9 = vadd.f32 %v2244_v35, %v2160_v61  ;;  %v4763_v11 = vld [vmem:[#allocation22_spill] sm:$0xff] }
 0x65d   : > { %v3105_v40 = vpop.eup %3104 }
 0x65e   : > { %v2059_v42 = vpop.xlane.xlu0 %2058  ;;  %v2161_v0 = vmul.f32 %v3105_v40, %v4311_v20  ;;  %v2162_v36 = vmul.f32 %v3105_v40, %v4313_v14  ;;  %v4762_v40 = vld [vmem:[#allocation20_spill] sm:$0xff] }
 0x65f   : > { %3110 = vrcp.f32 %v2059_v42 }
 0x660   : > { %v2209_v18 = vadd.f32 %v2208_v17, %v2161_v0  ;;  %v2246_v3 = vadd.f32 %v2245_v9, %v2162_v36  ;;  %v4765_v36 = vld [vmem:[#allocation18_spill] sm:$0xff] }
 0x661   : > { %v3107_v4 = vpop.eup %3106 }
 0x662   : > { %v2062_v60 = vpop.xlane.xlu1 %2061  ;;  %v2163_v39 = vmul.f32 %v3107_v4, %v4319_v19  ;;  %v2164_v62 = vmul.f32 %v3107_v4, %v4321_v44 }
 0x663   : > { %3112 = vrcp.f32 %v2062_v60 }
 0x664   : > { %v2210_v53 = vadd.f32 %v2209_v18, %v2163_v39  ;;  %v2247_v30 = vadd.f32 %v2246_v3, %v2164_v62 }
 0x665   : > { %v3109_v48 = vpop.eup %3108 }
 0x666   : > { %v2065_v51 = vpop.xlane.xlu0 %2064  ;;  %v2165_v7 = vmul.f32 %v3109_v48, %v4327_v25  ;;  %v2166_v20 = vmul.f32 %v3109_v48, %v4329_v57  ;;  %v4766_v48 = vld [vmem:[#allocation6_spill] sm:$0xff] }
 0x667   : > { %3114 = vrcp.f32 %v2065_v51 }
 0x668   : > { %v2211_v56 = vadd.f32 %v2210_v53, %v2165_v7  ;;  %v2248_v42 = vadd.f32 %v2247_v30, %v2166_v20  ;;  %v4768_v53 = vld [vmem:[#allocation5_spill] sm:$0xff] }
 0x669   : > { %v3111_v50 = vpop.eup %3110 }
 0x66a   : > { %v2068_v32 = vpop.xlane.xlu1 %2067  ;;  %v2167_v47 = vmul.f32 %v3111_v50, %v4335_v49  ;;  %v2168_v19 = vmul.f32 %v3111_v50, %v4337_v55 }
 0x66b   : > { %3116 = vrcp.f32 %v2068_v32 }
 0x66c   : > { %v2212_v63 = vadd.f32 %v2211_v56, %v2167_v47  ;;  %v2249_v41 = vadd.f32 %v2248_v42, %v2168_v19  ;;  %v4770_v42 = vld [vmem:[#allocation10_spill] sm:$0xff] }
 0x66d   : > { %v3113_v14 = vpop.eup %3112 }
 0x66e   : > { %v2071_v45 = vpop.xlane.xlu0 %2070  ;;  %v2169_v52 = vmul.f32 %v3113_v14, %v4343_v29  ;;  %v2170_v25 = vmul.f32 %v3113_v14, %v4345_v59 }
 0x66f   : > { %3118 = vrcp.f32 %v2071_v45  ;;  %v4764_v45 = vld [vmem:[#allocation24_spill] sm:$0xff] }
 0x670   : > { %v2213_v22 = vadd.f32 %v2212_v63, %v2169_v52  ;;  %v2250_v38 = vadd.f32 %v2249_v41, %v2170_v25 }
 0x671   : > { %v3115_v44 = vpop.eup %3114 }
 0x672   : > { %v2074_v8 = vpop.xlane.xlu1 %2073  ;;  %v2171_v58 = vmul.f32 %v3115_v44, %v4351_v16  ;;  %v2172_v49 = vmul.f32 %v3115_v44, %v4353_v1  ;;  %v4769_v44 = vld [vmem:[#allocation7_spill] sm:$0xff] }
 0x673   : > { %3120 = vrcp.f32 %v2074_v8 }
 0x674   : > { %v2214_v59 = vadd.f32 %v2213_v22, %v2171_v58  ;;  %v2251_v24 = vadd.f32 %v2250_v38, %v2172_v49  ;;  %v4774_v22 = vld [vmem:[#allocation14_spill] sm:$0xff] }
 0x675   : > { %v3117_v57 = vpop.eup %3116 }
 0x676   : > { %v2077_v27 = vpop.xlane.xlu0 %2076  ;;  %v2173_v6 = vmul.f32 %v3117_v57, %v4359_v34  ;;  %v2174_v29 = vmul.f32 %v3117_v57, %v4361_v13  ;;  %v4772_v57 = vld [vmem:[#allocation11_spill] sm:$0xff] }
 0x677   : > { %3122 = vrcp.f32 %v2077_v27 }
 0x678   : > { %v2215_v1 = vadd.f32 %v2214_v59, %v2173_v6  ;;  %v2252_v10 = vadd.f32 %v2251_v24, %v2174_v29 }
 0x679   : > { %v3119_v55 = vpop.eup %3118 }
 0x67a   : > { %v2080_v2 = vpop.xlane.xlu1 %2079  ;;  %v2175_v51 = vmul.f32 %v3119_v55, %v4367_v12  ;;  %v2176_v33 = vmul.f32 %v3119_v55, %v4760_v54 }
 0x67b   : > { %3124 = vrcp.f32 %v2080_v2  ;;  %v4767_v2 = vld [vmem:[#allocation8_spill] sm:$0xff] }
 0x67c   : > { %v2216_v23 = vadd.f32 %v2215_v1, %v2175_v51  ;;  %v2253_v13 = vadd.f32 %v2252_v10, %v2176_v33  ;;  %v4775_v51 = vld [vmem:[#allocation16_spill] sm:$0xff]  ;;  %v4776_v33 = vld [vmem:[#allocation13_spill] sm:$0xff] }
 0x67d   : > { %v3121_v5 = vpop.eup %3120 }
 0x67e   : > { %v2083_v26 = vpop.xlane.xlu0 %2082  ;;  %v2177_v32 = vmul.f32 %v3121_v5, %v4761_v28  ;;  %v2178_v21 = vmul.f32 %v3121_v5, %v4762_v40 }
 0x67f   : > { %3126 = vrcp.f32 %v2083_v26 }
 0x680   : > { %v2217_v35 = vadd.f32 %v2216_v23, %v2177_v32  ;;  %v2254_v0 = vadd.f32 %v2253_v13, %v2178_v21 }
 0x681   : > { %v3123_v46 = vpop.eup %3122 }
 0x682   : > { %v2086_v43 = vpop.xlane.xlu1 %2085  ;;  %v2179_v61 = vmul.f32 %v3123_v46, %v4763_v11  ;;  %v2180_v4 = vmul.f32 %v3123_v46, %v4764_v45 }
 0x683   : > { %3128 = vrcp.f32 %v2086_v43  ;;  %v4771_v43 = vld [vmem:[#allocation9_spill] sm:$0xff] }
 0x684   : > { %v2218_v39 = vadd.f32 %v2217_v35, %v2179_v61  ;;  %v2255_v62 = vadd.f32 %v2254_v0, %v2180_v4 }
 0x685   : > { %v3125_v34 = vpop.eup %3124 }
 0x686   : > { %v2089_v60 = vpop.xlane.xlu0 %2088  ;;  %v2181_v8 = vmul.f32 %v3125_v34, %v4765_v36  ;;  %v2182_v17 = vmul.f32 %v3125_v34, %v4766_v48 }
 0x687   : > { %3130 = vrcp.f32 %v2089_v60  ;;  %v4773_v60 = vld [vmem:[#allocation12_spill] sm:$0xff] }
 0x688   : > { %v2219_v7 = vadd.f32 %v2218_v39, %v2181_v8  ;;  %v2256_v20 = vadd.f32 %v2255_v62, %v2182_v17  ;;  %v4777_v8 = vld [vmem:[#allocation15_spill] sm:$0xff] }
 0x689   : > { %v3127_v12 = vpop.eup %3126 }
 0x68a   : > { %v2092_v16 = vpop.xlane.xlu1 %2091  ;;  %v2183_v27 = vmul.f32 %v3127_v12, %v4399_v37  ;;  %v2184_v50 = vmul.f32 %v3127_v12, %v4401_v15 }
 0x68b   : > { %3132 = vrcp.f32 %v2092_v16 }
 0x68c   : > { %v2220_v19 = vadd.f32 %v2219_v7, %v2183_v27  ;;  %v2257_v26 = vadd.f32 %v2256_v20, %v2184_v50 }
 0x68d   : > { %v3129_v9 = vpop.eup %3128 }
 0x68e   : > { %v2095_v31 = vpop.xlane.xlu0 %2094  ;;  %v2185_v14 = vmul.f32 %v3129_v9, %v4767_v2  ;;  %v2186_v30 = vmul.f32 %v3129_v9, %v4768_v53  ;;  %v2386_v9 = vld [vmem:[%s4571_s2] sm:$0xff] }
 0x68f   : > { %3134 = vrcp.f32 %v2095_v31 }
 0x690   : > { %v2221_v25 = vadd.f32 %v2220_v19, %v2185_v14  ;;  %v2258_v37 = vadd.f32 %v2257_v26, %v2186_v30  ;;  %v3142_v19 = vld [vmem:[%s3290_s5] sm:$0xff] }
 0x691   : > { %v3131_v3 = vpop.eup %3130 }
 0x692   : > { %v2098_v18 = vpop.xlane.xlu1 %2097  ;;  %v2187_v56 = vmul.f32 %v3131_v3, %v4769_v44  ;;  %v2188_v52 = vmul.f32 %v3131_v3, %v4770_v42 }
 0x693   : > { %3136 = vrcp.f32 %v2098_v18 }
 0x694   : > { %v2222_v58 = vadd.f32 %v2221_v25, %v2187_v56  ;;  %v2259_v49 = vadd.f32 %v2258_v37, %v2188_v52  ;;  %v3143_v25 = vld [vmem:[%s3290_s5 + $0x8] sm:$0xff]  ;;  %s2484_s5 = scalar_lea.sflag [#allocation3], %s188_s27 }
 0x695   : > { %v3133_v47 = vpop.eup %3132 }
 0x696   : > { %v2189_v15 = vmul.f32 %v3133_v47, %v4771_v43  ;;  %v2190_v63 = vmul.f32 %v3133_v47, %v4772_v57 }
 0x698   : > { %v2223_v6 = vadd.f32 %v2222_v58, %v2189_v15  ;;  %v2260_v29 = vadd.f32 %v2259_v49, %v2190_v63 }
 0x699   : > { %v3135_v41 = vpop.eup %3134 }
 0x69a   : > { %v2191_v55 = vmul.f32 %v3135_v41, %v4773_v60  ;;  %v2192_v38 = vmul.f32 %v3135_v41, %v4774_v22 }
 0x69c   : > { %v2224_v59 = vadd.f32 %v2223_v6, %v2191_v55  ;;  %v2261_v24 = vadd.f32 %v2260_v29, %v2192_v38 }
 0x69d   : > { %v3137_v5 = vpop.eup %3136 }
 0x69e   : > { %v2193_v54 = vmul.f32 %v3137_v5, %v4775_v51  ;;  %v2194_v16 = vmul.f32 %v3137_v5, %v4776_v33 }
 0x6a0   : > { %v2225_v46 = vadd.f32 %v2224_v59, %v2193_v54  ;;  %v2262_v1 = vadd.f32 %v2261_v24, %v2194_v16 }
 0x6a2   : > { %v2226_v10 = vrot.slane %v2225_v46, 4  ;;  %v2263_v28 = vrot.slane %v2262_v1, 4 }
 0x6a4   : > { %v2227_v32 = vadd.f32 %v2226_v10, %v2225_v46  ;;  %v2264_v40 = vadd.f32 %v2263_v28, %v2262_v1 }
 0x6a6   : > { %v2228_v21 = vrot.slane %v2227_v32, 2  ;;  %v2265_v34 = vrot.slane %v2264_v40, 2 }
 0x6a8   : > { %v2229_v23 = vadd.f32 %v2228_v21, %v2227_v32  ;;  %v2266_v13 = vadd.f32 %v2265_v34, %v2264_v40 }
 0x6aa   : > { %v2230_v11 = vrot.slane %v2229_v23, 1  ;;  %v2267_v61 = vrot.slane %v2266_v13, 1 }
 0x6ac   : > { %v2231_v45 = vadd.f32 %v2230_v11, %v2229_v23  ;;  %v2268_v4 = vadd.f32 %v2267_v61, %v2266_v13 }
 0x6ae   : > { %v2272_v31 = vmin.f32 %v2231_v45, %v2268_v4  ;;  %v2269_v12 = vmax.f32 %v2231_v45, %v2268_v4 }
 0x6b0   : > { %2273 = vmin.xlane.f32.xlu1 %v2272_v31  ;;  %2270 = vmax.xlane.f32.xlu0 %v2269_v12 }
 0x6ba   : > { %v2381_v35 = vpop.xlane.xlu1 %2380  ;;  %v2378_v0 = vpop.xlane.xlu0 %2377 }
 0x6bb   : > { %v2383_v36 = vsub.f32 %v2378_v0, %v2381_v35  ;;  %v2382_v48 = vsub.f32 %v4777_v8, %v2381_v35 }
 0x6bd   : > { %3138 = vrcp.f32 %v2383_v36 }
 0x6c7   : > { %v3139_v17 = vpop.eup %3138 }
 0x6c8   : > { %v2385_v39 = vmul.f32 %v3139_v17, %v2382_v48 }
 0x6ca   : > { %v2387_v62 = vmul.f32 %v2386_v9, %v2385_v39 }
 0x6cb   : > { %v2470_v50 = vpop.f32.mrb[68].mxu0 }
 0x6cc   : > { %v2388_v27 = vsel %vm380_vm2, %v2387_v62, 0.0  ;;  %v2472_v18 = vpop.f32.mrb[69].mxu0  ;;  %v2475_v2 = vmax.f32 %v2470_v50, 0.0 }
 0x6cd   : > { %2389 = vadd.xlane.f32.xlu0 %v2388_v27  ;;  %v2476_v14 = vmax.f32 %v2472_v18, 0.0 }
 0x6ce   : > { %v2477_v26 = vadd.f32 %v3142_v19, %v2475_v2 }
 0x6cf   : > { %v2478_v37 = vadd.f32 %v3143_v25, %v2476_v14 }
 0x73d   : > { %v2274_v3 = vpop.xlane.xlu1 %2273  ;;  %v2271_v7 = vpop.xlane.xlu0 %2270 }
 0x73e   : > { %v2277_v20 = vsub.f32 %v2271_v7, %v2274_v3  ;;  %v2275_v30 = vsub.f32 %v2231_v45, %v2274_v3  ;;  %v2276_v47 = vsub.f32 %v2268_v4, %v2274_v3 }
 0x740   : > { %3140 = vrcp.f32 %v2277_v20 }
 0x74a   : > { %v3141_v53 = vpop.eup %3140 }
 0x74b   : > { %v2279_v56 = vmul.f32 %v3141_v53, %v2275_v30  ;;  %v2280_v42 = vmul.f32 %v3141_v53, %v2276_v47 }
 0x75a   : > { %v2390_v44 = vpop.xlane.xlu0 %2389 }
 0x75b   : > { %v2391_v52 = vmax.f32 %v2390_v44, 0.0 }
 0x75d   : > { %v2392_v43 = vadd.f32 %v2391_v52, %v2279_v56  ;;  %v2393_v15 = vadd.f32 %v2391_v52, %v2280_v42 }
 0x75f   : > { %v2479_v57 = vmul.f32 %v2477_v26, %v2392_v43  ;;  %v2480_v63 = vmul.f32 %v2478_v37, %v2393_v15 }
 0x761   : > { %2481 = vst [vmem:[%s190_s30] sm:$0xff] %v2479_v57  ;;  %2482 = vst [vmem:[%s190_s30 + $0x8] sm:$0xff] %v2480_v63 }
 0x762   : > { %3157 = shalt.err (!%p3154_p3)
}
 0x763   : > { %s3158_s13 = scalar_lea.hbm %s4527_s9, 256  ;;  %s3162_s22 = scalar_lea.hbm %s4573_s4, 512 }
 0x764   : > { %p3159_p4 = scmp.ne.s32.totalorder %s4527_s9, %s3158_s13  ;;  %p3163_p9 = scmp.lt.u32.totalorder %s4527_s9, %s4573_s4 }
 0x765   : > { %p3164_p10 = scmp.lt.u32.totalorder %s3162_s22, %s3158_s13  ;;  %p3166_p12 = scmp.lt.u32.totalorder %s3158_s13, %s4527_s9 }
 0x766   : > { %p3160_p7 = pnand %p3159_p4, %p3273_p5 }
 0x767   : > { %p3165_p11 = por %p3164_p10, %p3163_p9 }
 0x768   : > { %p3161_p8 = pneg %p3160_p7 }
 0x769   : > { %p3167_p13 = por %p3166_p12, %p3165_p11 }
 0x76b   : > { %p3168_p0 = pnand %p3167_p13, %p3161_p8 }
 0x76d   : > { %3171 = shalt.err (!%p3168_p0)
}
 0x76e   : > { %2710 = dma.vmem_to_hbm [thread:$0]  (%p3273_p5), %s4529_s6, 256, %s4527_s9, %s2484_s5  }
 0x76f PF: > { %p2716_p1 = scmp.ge.s32.totalorder %s3206_s18, 2  ;;  %s2510_s28 = sand.u32 1, %s3194_s15  }
 0x770   : > { %s2511_s29 = scalar_lea.sflag [#allocation3], %s2510_s28 }
 0x771   : > { %p2713_p2 = pnand %p2716_p1, %p3277_p6 }
 0x773   : > { %3189 = dma.done.wait (!%p2713_p2), %s2511_s29, 256  }
 0x774   : > { %3191 = vsyncadd (!%p2713_p2), %s2511_s29, 4294967040  ;;  %p14_p3 = scmp.ge.s32.totalorder %s3260_s21, 4   ;;  %s4778_s15 = smov %s3198_s16 }
 0x775   : > { %s4779_s16 = smov %s3202_s17  ;;  %s4780_s17 = smov %s3271_s24 }
 0x776   : > { %s4781_s18 = smov %s3260_s21  ;;  %16 = sbr.rel (!%p14_p3) target bundleno = 3 (0x3), region = 71 }
 0x77d   :  { %2516 = vsyncpa [#allocation3], 1 }
 0x77e   :  { %2518 = vsyncpa [#allocation3 + $0x1], 1 }

</bundles_post_ra>
